<compile_context>
chip_gen: v7x
topology: tpu7x:2x2x1
jax: 0.10.0
libtpu: 0.0.40
codegen_flags: <defaults>
</compile_context>

<pallas_src>
import functools

import jax
import jax.numpy as jnp
from jax import lax
from jax.experimental import pallas as pl
from jax.experimental.pallas import tpu as pltpu

POOL_SIZES = (1, 5, 9, 13)
# Stride-1 max pools compose with radii adding (morphological dilation), so
# cascading radius-2 pools reproduces the 5 -> 9 -> 13 pools (SPPF trick).
_CASCADE_RADII = tuple(
    (POOL_SIZES[i] // 2) - (POOL_SIZES[i - 1] // 2) for i in range(1, len(POOL_SIZES))
)
assert POOL_SIZES[0] == 1 and all(r > 0 for r in _CASCADE_RADII)
_MAX_RADIUS = max(_CASCADE_RADII)
_N_MASK_ROWS = 4 * _MAX_RADIUS       # per radius: [+W, -W, +H, -H]
_LANE = 128


def _tree_max(vals):
    """Pairwise (log-depth) max reduction — shortens the VALU dep chain."""
    while len(vals) > 1:
        nxt = [jnp.maximum(vals[i], vals[i + 1]) for i in range(0, len(vals) - 1, 2)]
        if len(vals) % 2:
            nxt.append(vals[-1])
        vals = nxt
    return vals[0]


def _tap_masks(height, width, s_pad, max_radius, dtype):
    """Tap-validity rows (1 = tap inside the image / same row, 0 = off-edge),
    built ONCE in the wrapper from the REAL H/W/S so zero-padded lanes never
    leak into real pixels.  Shape (4*max_radius, s_pad)."""
    s_real = height * width
    f = jnp.arange(s_pad, dtype=jnp.int32)[None, :]
    wpos = f % width
    rows = []
    for d in range(1, max_radius + 1):
        rows.append(wpos < width - d)          # tap x[f + d]   (same image row)
        rows.append(wpos >= d)                 # tap x[f - d]   (same image row)
        rows.append(f < s_real - d * width)    # tap x[f + d*W] (rows below)
        rows.append(f >= d * width)            # tap x[f - d*W] (rows above)
    return jnp.concatenate(rows, axis=0).astype(dtype)


def _maxpool_sep(x, masks, width, height, radius):
    """(2*radius+1)^2, stride-1, pad-radius max pool (MaxPool2d semantics) on
    (channels, H*W[+pad]) data: separable shifted maxima using XLU lane rolls;
    off-edge taps are replaced by -inf via select (NaN-safe)."""
    s_pad = x.shape[-1]
    neg = jnp.asarray(-jnp.inf, x.dtype)

    # --- pool along W (within each image row) ---
    terms = [x]
    for d in range(1, radius + 1):
        if d >= width:
            continue
        wf, wb, _, _ = masks[d - 1]
        terms.append(jnp.where(wf, pltpu.roll(x, shift=s_pad - d, axis=1), neg))  # x[f+d]
        terms.append(jnp.where(wb, pltpu.roll(x, shift=d, axis=1), neg))          # x[f-d]
    r = _tree_max(terms)

    # --- pool along H (across rows == shifts by multiples of W) ---
    terms = [r]
    for d in range(1, radius + 1):
        if d >= height:
            continue
        sh = d * width
        _, _, hf, hb = masks[d - 1]
        terms.append(jnp.where(hf, pltpu.roll(r, shift=s_pad - sh, axis=1), neg))  # r[f+dW]
        terms.append(jnp.where(hb, pltpu.roll(r, shift=sh, axis=1), neg))          # r[f-dW]
    return _tree_max(terms)


def spp_kernel(mask_ref, x_ref, w_ref, b_ref, o_ref, stage_ref, *acc_scratch,
               width, height, num_cc):
    # mask_ref:  (8, S)              precomputed tap-validity rows (resident)
    # x_ref:     (1, tc, S)          one input-channel chunk, spatial lane-dense
    # w_ref:     (1, co, 4*tc)       pool-major 1x1-conv weight block
    # b_ref:     (co, 1)             conv bias (f32)
    # o_ref:     (1, co, S)          output block (revisited across the cc axis)
    # stage_ref: (4*tc, S)           staging slab for the fused deep-K matmul
    # acc_scratch: ((co, S) f32,) only when num_cc > 1
    cc = pl.program_id(2)
    tc = x_ref.shape[1]

    x = x_ref[0]                                   # (tc, S)
    valid = mask_ref[...] != 0                     # one cheap compare; reused by all taps
    masks = [tuple(valid[4 * d + k:4 * d + k + 1] for k in range(4))
             for d in range(_MAX_RADIUS)]

    # SPPF cascade staged into one (4*tc, S) slab -> a single deep-K 1x1-conv dot.
    stage_ref[pl.ds(0, tc), :] = x                 # pool size 1 == identity
    p = x
    for i, radius in enumerate(_CASCADE_RADII, start=1):   # radii 2,2,2 -> k = 5, 9, 13
        p = _maxpool_sep(p, masks, width, height, radius)
        stage_ref[pl.ds(i * tc, tc), :] = p

    if num_cc == 1:
        # Whole contraction in one step: no accumulator scratch, direct store.
        o_ref[0] = (jnp.dot(w_ref[0], stage_ref[...],
                            preferred_element_type=jnp.float32)
                    + b_ref[...]).astype(o_ref.dtype)
    else:
        acc_ref = acc_scratch[0]

        @pl.when(cc == 0)
        def _init():
            acc_ref[...] = jnp.zeros_like(acc_ref)

        # Accumulate straight into the VMEM scratch (no full-tile value carry).
        acc_ref[...] += jnp.dot(w_ref[0], stage_ref[...],
                                preferred_element_type=jnp.float32)

        @pl.when(cc == num_cc - 1)
        def _store():
            o_ref[0] = (acc_ref[...] + b_ref[...]).astype(o_ref.dtype)


def spatial_pyramid_pooling(x_nchw, w_conv, b_conv, *, c_chunk=None, cout_chunk=None):
    """x_nchw: (N, C, H, W); w_conv: (C, 4C, 1, 1); b_conv: (C,) -> (N, C, H, W)."""
    N, C, H, W = x_nchw.shape
    P = len(POOL_SIZES)
    assert w_conv.shape == (C, P * C, 1, 1) and b_conv.shape == (C,)
    S = H * W
    S_pad = pl.cdiv(S, _LANE) * _LANE              # lane-dense output / full MXU width
    dtype = x_nchw.dtype
    elt = jnp.dtype(dtype).itemsize

    # Optional output-channel tiling: gives a second "parallel" grid axis so both
    # v7x TensorCores stay busy at small batch (pooling is recomputed per tile,
    # cheap next to the MXU work at real sizes). Default: no split.
    if cout_chunk is None:
        cout_chunk = C
    assert C % cout_chunk == 0 and (cout_chunk == C or cout_chunk % 8 == 0)
    n_co = C // cout_chunk

    # Generation-aware VMEM budget (v5e/v6e 128 MiB, v7x 64 MiB per TC).
    try:
        vmem_cap = int(getattr(pltpu.get_tpu_info(), "vmem_capacity_bytes",
                               64 * 2**20))
    except Exception:  # pragma: no cover - off-TPU / interpret fallbacks
        vmem_cap = 64 * 2**20
    budget = int(0.7 * vmem_cap)

    def _footprint(tc):
        ncc = C // tc
        fp = 2 * tc * S_pad * elt                  # input chunk (double-buffered)
        fp += 2 * cout_chunk * P * tc * elt        # weight block
        fp += 2 * cout_chunk * S_pad * elt         # output block
        fp += P * tc * S_pad * elt                 # staging scratch
        fp += 2 * _N_MASK_ROWS * S_pad * elt       # tap masks
        fp += 2 * cout_chunk * 4                   # bias
        if ncc > 1:
            fp += cout_chunk * S_pad * 4           # f32 accumulator
        return fp

    if c_chunk is None:
        # Prefer the whole contraction resident (weights DMA'd once, no cc axis);
        # only chunk the input channels when the footprint overshoots the budget.
        cands = [C] + [d for d in (512, 256, 128) if C % d == 0 and d < C]
        c_chunk = cands[-1]
        for cand in cands:
            if _footprint(cand) <= budget:
                c_chunk = cand
                break
        # TODO(synk): if even the smallest chunk overshoots VMEM (huge H*W), tile
        # the spatial axis with a 2*max_radius-row halo instead of shrinking C.
    assert C % c_chunk == 0
    num_cc = C // c_chunk

    fp = _footprint(c_chunk)
    vmem_limit = int(min(vmem_cap, max(32 * 2**20, 2 * fp)))

    # NCHW -> (N, C, S_pad): pure reshape (spatial lane-dense) + zero pad.
    x_flat = x_nchw.reshape(N, C, S)
    if S_pad != S:
        x_flat = jnp.pad(x_flat, ((0, 0), (0, 0), (0, S_pad - S)))

    # (C_out, 4*C_in, 1, 1) -> (num_cc, C_out, P*c_chunk), pool-major within the
    # contraction dim (matches torch.cat order + the staging-slab row order), so
    # one deep-K dot replaces the four per-pool matmuls.
    w_r = jnp.transpose(w_conv.reshape(C, P, num_cc, c_chunk), (2, 0, 1, 3))
    w_r = w_r.reshape(num_cc, C, P * c_chunk).astype(dtype)
    b = b_conv.reshape(C, 1).astype(jnp.float32)

    masks = _tap_masks(H, W, S_pad, _MAX_RADIUS, dtype)

    scratch_shapes = [pltpu.VMEM((P * c_chunk, S_pad), dtype)]
    if num_cc > 1:
        scratch_shapes.append(pltpu.VMEM((cout_chunk, S_pad), jnp.float32))

    out_flat = pl.pallas_call(
        functools.partial(spp_kernel, width=W, height=H, num_cc=num_cc),
        out_shape=jax.ShapeDtypeStruct((N, C, S_pad), dtype),
        grid=(N, n_co, num_cc),
        in_specs=[
            pl.BlockSpec((_N_MASK_ROWS, S_pad), lambda n, co, cc: (0, 0)),
            pl.BlockSpec((1, c_chunk, S_pad), lambda n, co, cc: (n, cc, 0)),
            pl.BlockSpec((1, cout_chunk, P * c_chunk), lambda n, co, cc: (cc, co, 0)),
            pl.BlockSpec((cout_chunk, 1), lambda n, co, cc: (co, 0)),
        ],
        out_specs=pl.BlockSpec((1, cout_chunk, S_pad), lambda n, co, cc: (n, co, 0)),
        scratch_shapes=scratch_shapes,
        compiler_params=pltpu.CompilerParams(
            dimension_semantics=("parallel", "parallel", "arbitrary"),
            vmem_limit_bytes=vmem_limit,
        ),
    )(masks, x_flat, w_r, b)

    return out_flat[:, :, :S].reshape(N, C, H, W)


def spp_reference(x_nchw, w_conv, b_conv):
    """Pure-JAX reference (matches PyTorch SPP forward)."""
    C = x_nchw.shape[1]
    pooled = []
    for k in POOL_SIZES:
        p = k // 2
        pooled.append(
            lax.reduce_window(
                x_nchw, -jnp.inf, lax.max,
                window_dimensions=(1, 1, k, k),
                window_strides=(1, 1, 1, 1),
                padding=[(0, 0), (0, 0), (p, p), (p, p)],
            )
        )
    cat = jnp.concatenate(pooled, axis=1)                  # (N, 4C, H, W)
    w2d = w_conv.reshape(C, cat.shape[1])                  # (C, 4C)
    return jnp.einsum("nihw,oi->nohw", cat, w2d) + b_conv[None, :, None, None]


if __name__ == "__main__":
    root = jax.random.PRNGKey(0)

    def run_case(key, N, C, H, W, **kw):
        C4 = C * len(POOL_SIZES)
        kx, kwt, kb = jax.random.split(key, 3)
        x = jax.random.normal(kx, (N, C, H, W), dtype=jnp.float32)
        bound = 1.0 / jnp.sqrt(jnp.float32(C4))
        w_conv = jax.random.uniform(kwt, (C, C4, 1, 1), jnp.float32, -bound, bound)
        b_conv = jax.random.uniform(kb, (C,), jnp.float32, -bound, bound)
        out = jax.block_until_ready(spatial_pyramid_pooling(x, w_conv, b_conv, **kw))
        ref = spp_reference(x, w_conv, b_conv)
        assert out.shape == (N, C, H, W), out.shape
        err = float(jnp.max(jnp.abs(out - ref)))
        assert jnp.allclose(out, ref, atol=2e-4, rtol=2e-4), err

    k1, k2, k3 = jax.random.split(root, 3)
    run_case(k1, 2, 4, 16, 16)               # lane-aligned spatial, resident weights
    run_case(k2, 1, 8, 13, 13)               # odd S=169 -> zero-padded to 256 lanes
    run_case(k3, 1, 8, 5, 7, c_chunk=4)      # exercises the chunked-accumulator path
    print("KERNEL_OK")
</pallas_src>

<mosaic_0001>
module attributes {stable_mosaic.version = 11 : i64} {
  func.func @spp_kernel(%arg0: i32, %arg1: i32, %arg2: i32, %arg3: memref<8x256xf32, #tpu.memory_space<vmem>>, %arg4: memref<1x4x256xf32, #tpu.memory_space<vmem>>, %arg5: memref<1x4x16xf32, #tpu.memory_space<vmem>>, %arg6: memref<4x1xf32, #tpu.memory_space<vmem>>, %arg7: memref<1x4x256xf32, #tpu.memory_space<vmem>>, %arg8: memref<16x256xf32, #tpu.memory_space<vmem>>) attributes {dimension_semantics = [#tpu.dimension_semantics<parallel>, #tpu.dimension_semantics<parallel>, #tpu.dimension_semantics<arbitrary>], iteration_bounds = array<i64: 2, 1, 1>, scalar_prefetch = 0 : i64, scratch_operands = 1 : i64, tpu.core_type = #tpu.core_type<tc>, window_params = [{pipeline_mode = #tpu.pipeline_mode<synchronous>, transform_indices = @transform_0, window_bounds = array<i64: 8, 256>}, {transform_indices = @transform_1, window_bounds = array<i64: 1, 4, 256>}, {transform_indices = @transform_2, window_bounds = array<i64: 1, 4, 16>}, {transform_indices = @transform_3, window_bounds = array<i64: 4, 1>}, {transform_indices = @transform_4, window_bounds = array<i64: 1, 4, 256>}]} {
    %c0 = arith.constant 0 : index
    %c0_0 = arith.constant 0 : index
    %c0_1 = arith.constant 0 : index
    %0 = vector.load %arg4[%c0, %c0_0, %c0_1] : memref<1x4x256xf32, #tpu.memory_space<vmem>>, vector<1x4x256xf32>
    %1 = vector.shape_cast %0 : vector<1x4x256xf32> to vector<4x256xf32>
    %c0_2 = arith.constant 0 : index
    %c0_3 = arith.constant 0 : index
    %2 = vector.load %arg3[%c0_2, %c0_3] : memref<8x256xf32, #tpu.memory_space<vmem>>, vector<8x256xf32>
    %cst = arith.constant 0.000000e+00 : f32
    %3 = vector.broadcast %cst : f32 to vector<8x256xf32>
    %4 = arith.cmpf one, %2, %3 : vector<8x256xf32>
    %5 = vector.extract_strided_slice %4 {offsets = [0, 0], sizes = [1, 256], strides = [1, 1]} : vector<8x256xi1> to vector<1x256xi1>
    %6 = vector.extract_strided_slice %4 {offsets = [1, 0], sizes = [1, 256], strides = [1, 1]} : vector<8x256xi1> to vector<1x256xi1>
    %7 = vector.extract_strided_slice %4 {offsets = [2, 0], sizes = [1, 256], strides = [1, 1]} : vector<8x256xi1> to vector<1x256xi1>
    %8 = vector.extract_strided_slice %4 {offsets = [3, 0], sizes = [1, 256], strides = [1, 1]} : vector<8x256xi1> to vector<1x256xi1>
    %9 = vector.extract_strided_slice %4 {offsets = [4, 0], sizes = [1, 256], strides = [1, 1]} : vector<8x256xi1> to vector<1x256xi1>
    %10 = vector.extract_strided_slice %4 {offsets = [5, 0], sizes = [1, 256], strides = [1, 1]} : vector<8x256xi1> to vector<1x256xi1>
    %11 = vector.extract_strided_slice %4 {offsets = [6, 0], sizes = [1, 256], strides = [1, 1]} : vector<8x256xi1> to vector<1x256xi1>
    %12 = vector.extract_strided_slice %4 {offsets = [7, 0], sizes = [1, 256], strides = [1, 1]} : vector<8x256xi1> to vector<1x256xi1>
    %c0_4 = arith.constant 0 : index
    %c0_5 = arith.constant 0 : index
    %13 = vector.load %arg8[%c0_4, %c0_5] : memref<16x256xf32, #tpu.memory_space<vmem>>, vector<4x256xf32>
    tpu.vector_store %arg8[%c0_4, %c0_5], %1 {strides = array<i32>} : memref<16x256xf32, #tpu.memory_space<vmem>>, vector<4x256xf32>,
    %c255_i32 = arith.constant 255 : i32
    %14 = tpu.dynamic_rotate %1 by %c255_i32 dim 1 : vector<4x256xf32>, i32 -> vector<4x256xf32>
    %cst_6 = arith.constant 0xFF800000 : f32
    %15 = vector.shape_cast %5 : vector<1x256xi1> to vector<1x256xi1>
    %16 = vector.broadcast %15 : vector<1x256xi1> to vector<4x256xi1>
    %17 = vector.broadcast %cst_6 : f32 to vector<4x256xf32>
    %18 = arith.select %16, %14, %17 : vector<4x256xi1>, vector<4x256xf32>
    %c1_i32 = arith.constant 1 : i32
    %19 = tpu.dynamic_rotate %1 by %c1_i32 dim 1 : vector<4x256xf32>, i32 -> vector<4x256xf32>
    %cst_7 = arith.constant 0xFF800000 : f32
    %20 = vector.shape_cast %6 : vector<1x256xi1> to vector<1x256xi1>
    %21 = vector.broadcast %20 : vector<1x256xi1> to vector<4x256xi1>
    %22 = vector.broadcast %cst_7 : f32 to vector<4x256xf32>
    %23 = arith.select %21, %19, %22 : vector<4x256xi1>, vector<4x256xf32>
    %c254_i32 = arith.constant 254 : i32
    %24 = tpu.dynamic_rotate %1 by %c254_i32 dim 1 : vector<4x256xf32>, i32 -> vector<4x256xf32>
    %cst_8 = arith.constant 0xFF800000 : f32
    %25 = vector.shape_cast %9 : vector<1x256xi1> to vector<1x256xi1>
    %26 = vector.broadcast %25 : vector<1x256xi1> to vector<4x256xi1>
    %27 = vector.broadcast %cst_8 : f32 to vector<4x256xf32>
    %28 = arith.select %26, %24, %27 : vector<4x256xi1>, vector<4x256xf32>
    %c2_i32 = arith.constant 2 : i32
    %29 = tpu.dynamic_rotate %1 by %c2_i32 dim 1 : vector<4x256xf32>, i32 -> vector<4x256xf32>
    %cst_9 = arith.constant 0xFF800000 : f32
    %30 = vector.shape_cast %10 : vector<1x256xi1> to vector<1x256xi1>
    %31 = vector.broadcast %30 : vector<1x256xi1> to vector<4x256xi1>
    %32 = vector.broadcast %cst_9 : f32 to vector<4x256xf32>
    %33 = arith.select %31, %29, %32 : vector<4x256xi1>, vector<4x256xf32>
    %34 = arith.maximumf %1, %18 : vector<4x256xf32>
    %35 = arith.maximumf %23, %28 : vector<4x256xf32>
    %36 = arith.maximumf %34, %35 : vector<4x256xf32>
    %37 = arith.maximumf %36, %33 : vector<4x256xf32>
    %c240_i32 = arith.constant 240 : i32
    %38 = tpu.dynamic_rotate %37 by %c240_i32 dim 1 : vector<4x256xf32>, i32 -> vector<4x256xf32>
    %cst_10 = arith.constant 0xFF800000 : f32
    %39 = vector.shape_cast %7 : vector<1x256xi1> to vector<1x256xi1>
    %40 = vector.broadcast %39 : vector<1x256xi1> to vector<4x256xi1>
    %41 = vector.broadcast %cst_10 : f32 to vector<4x256xf32>
    %42 = arith.select %40, %38, %41 : vector<4x256xi1>, vector<4x256xf32>
    %c16_i32 = arith.constant 16 : i32
    %43 = tpu.dynamic_rotate %37 by %c16_i32 dim 1 : vector<4x256xf32>, i32 -> vector<4x256xf32>
    %cst_11 = arith.constant 0xFF800000 : f32
    %44 = vector.shape_cast %8 : vector<1x256xi1> to vector<1x256xi1>
    %45 = vector.broadcast %44 : vector<1x256xi1> to vector<4x256xi1>
    %46 = vector.broadcast %cst_11 : f32 to vector<4x256xf32>
    %47 = arith.select %45, %43, %46 : vector<4x256xi1>, vector<4x256xf32>
    %c224_i32 = arith.constant 224 : i32
    %48 = tpu.dynamic_rotate %37 by %c224_i32 dim 1 : vector<4x256xf32>, i32 -> vector<4x256xf32>
    %cst_12 = arith.constant 0xFF800000 : f32
    %49 = vector.shape_cast %11 : vector<1x256xi1> to vector<1x256xi1>
    %50 = vector.broadcast %49 : vector<1x256xi1> to vector<4x256xi1>
    %51 = vector.broadcast %cst_12 : f32 to vector<4x256xf32>
    %52 = arith.select %50, %48, %51 : vector<4x256xi1>, vector<4x256xf32>
    %c32_i32 = arith.constant 32 : i32
    %53 = tpu.dynamic_rotate %37 by %c32_i32 dim 1 : vector<4x256xf32>, i32 -> vector<4x256xf32>
    %cst_13 = arith.constant 0xFF800000 : f32
    %54 = vector.shape_cast %12 : vector<1x256xi1> to vector<1x256xi1>
    %55 = vector.broadcast %54 : vector<1x256xi1> to vector<4x256xi1>
    %56 = vector.broadcast %cst_13 : f32 to vector<4x256xf32>
    %57 = arith.select %55, %53, %56 : vector<4x256xi1>, vector<4x256xf32>
    %58 = arith.maximumf %37, %42 : vector<4x256xf32>
    %59 = arith.maximumf %47, %52 : vector<4x256xf32>
    %60 = arith.maximumf %58, %59 : vector<4x256xf32>
    %61 = arith.maximumf %60, %57 : vector<4x256xf32>
    %c4 = arith.constant 4 : index
    %c0_14 = arith.constant 0 : index
    %62 = vector.load %arg8[%c4, %c0_14] : memref<16x256xf32, #tpu.memory_space<vmem>>, vector<4x256xf32>
    tpu.vector_store %arg8[%c4, %c0_14], %61 {strides = array<i32>} : memref<16x256xf32, #tpu.memory_space<vmem>>, vector<4x256xf32>,
    %c255_i32_15 = arith.constant 255 : i32
    %63 = tpu.dynamic_rotate %61 by %c255_i32_15 dim 1 : vector<4x256xf32>, i32 -> vector<4x256xf32>
    %cst_16 = arith.constant 0xFF800000 : f32
    %64 = vector.shape_cast %5 : vector<1x256xi1> to vector<1x256xi1>
    %65 = vector.broadcast %64 : vector<1x256xi1> to vector<4x256xi1>
    %66 = vector.broadcast %cst_16 : f32 to vector<4x256xf32>
    %67 = arith.select %65, %63, %66 : vector<4x256xi1>, vector<4x256xf32>
    %c1_i32_17 = arith.constant 1 : i32
    %68 = tpu.dynamic_rotate %61 by %c1_i32_17 dim 1 : vector<4x256xf32>, i32 -> vector<4x256xf32>
    %cst_18 = arith.constant 0xFF800000 : f32
    %69 = vector.shape_cast %6 : vector<1x256xi1> to vector<1x256xi1>
    %70 = vector.broadcast %69 : vector<1x256xi1> to vector<4x256xi1>
    %71 = vector.broadcast %cst_18 : f32 to vector<4x256xf32>
    %72 = arith.select %70, %68, %71 : vector<4x256xi1>, vector<4x256xf32>
    %c254_i32_19 = arith.constant 254 : i32
    %73 = tpu.dynamic_rotate %61 by %c254_i32_19 dim 1 : vector<4x256xf32>, i32 -> vector<4x256xf32>
    %cst_20 = arith.constant 0xFF800000 : f32
    %74 = vector.shape_cast %9 : vector<1x256xi1> to vector<1x256xi1>
    %75 = vector.broadcast %74 : vector<1x256xi1> to vector<4x256xi1>
    %76 = vector.broadcast %cst_20 : f32 to vector<4x256xf32>
    %77 = arith.select %75, %73, %76 : vector<4x256xi1>, vector<4x256xf32>
    %c2_i32_21 = arith.constant 2 : i32
    %78 = tpu.dynamic_rotate %61 by %c2_i32_21 dim 1 : vector<4x256xf32>, i32 -> vector<4x256xf32>
    %cst_22 = arith.constant 0xFF800000 : f32
    %79 = vector.shape_cast %10 : vector<1x256xi1> to vector<1x256xi1>
    %80 = vector.broadcast %79 : vector<1x256xi1> to vector<4x256xi1>
    %81 = vector.broadcast %cst_22 : f32 to vector<4x256xf32>
    %82 = arith.select %80, %78, %81 : vector<4x256xi1>, vector<4x256xf32>
    %83 = arith.maximumf %61, %67 : vector<4x256xf32>
    %84 = arith.maximumf %72, %77 : vector<4x256xf32>
    %85 = arith.maximumf %83, %84 : vector<4x256xf32>
    %86 = arith.maximumf %85, %82 : vector<4x256xf32>
    %c240_i32_23 = arith.constant 240 : i32
    %87 = tpu.dynamic_rotate %86 by %c240_i32_23 dim 1 : vector<4x256xf32>, i32 -> vector<4x256xf32>
    %cst_24 = arith.constant 0xFF800000 : f32
    %88 = vector.shape_cast %7 : vector<1x256xi1> to vector<1x256xi1>
    %89 = vector.broadcast %88 : vector<1x256xi1> to vector<4x256xi1>
    %90 = vector.broadcast %cst_24 : f32 to vector<4x256xf32>
    %91 = arith.select %89, %87, %90 : vector<4x256xi1>, vector<4x256xf32>
    %c16_i32_25 = arith.constant 16 : i32
    %92 = tpu.dynamic_rotate %86 by %c16_i32_25 dim 1 : vector<4x256xf32>, i32 -> vector<4x256xf32>
    %cst_26 = arith.constant 0xFF800000 : f32
    %93 = vector.shape_cast %8 : vector<1x256xi1> to vector<1x256xi1>
    %94 = vector.broadcast %93 : vector<1x256xi1> to vector<4x256xi1>
    %95 = vector.broadcast %cst_26 : f32 to vector<4x256xf32>
    %96 = arith.select %94, %92, %95 : vector<4x256xi1>, vector<4x256xf32>
    %c224_i32_27 = arith.constant 224 : i32
    %97 = tpu.dynamic_rotate %86 by %c224_i32_27 dim 1 : vector<4x256xf32>, i32 -> vector<4x256xf32>
    %cst_28 = arith.constant 0xFF800000 : f32
    %98 = vector.shape_cast %11 : vector<1x256xi1> to vector<1x256xi1>
    %99 = vector.broadcast %98 : vector<1x256xi1> to vector<4x256xi1>
    %100 = vector.broadcast %cst_28 : f32 to vector<4x256xf32>
    %101 = arith.select %99, %97, %100 : vector<4x256xi1>, vector<4x256xf32>
    %c32_i32_29 = arith.constant 32 : i32
    %102 = tpu.dynamic_rotate %86 by %c32_i32_29 dim 1 : vector<4x256xf32>, i32 -> vector<4x256xf32>
    %cst_30 = arith.constant 0xFF800000 : f32
    %103 = vector.shape_cast %12 : vector<1x256xi1> to vector<1x256xi1>
    %104 = vector.broadcast %103 : vector<1x256xi1> to vector<4x256xi1>
    %105 = vector.broadcast %cst_30 : f32 to vector<4x256xf32>
    %106 = arith.select %104, %102, %105 : vector<4x256xi1>, vector<4x256xf32>
    %107 = arith.maximumf %86, %91 : vector<4x256xf32>
    %108 = arith.maximumf %96, %101 : vector<4x256xf32>
    %109 = arith.maximumf %107, %108 : vector<4x256xf32>
    %110 = arith.maximumf %109, %106 : vector<4x256xf32>
    %c8 = arith.constant 8 : index
    %c0_31 = arith.constant 0 : index
    %111 = vector.load %arg8[%c8, %c0_31] : memref<16x256xf32, #tpu.memory_space<vmem>>, vector<4x256xf32>
    tpu.vector_store %arg8[%c8, %c0_31], %110 {strides = array<i32>} : memref<16x256xf32, #tpu.memory_space<vmem>>, vector<4x256xf32>,
    %c255_i32_32 = arith.constant 255 : i32
    %112 = tpu.dynamic_rotate %110 by %c255_i32_32 dim 1 : vector<4x256xf32>, i32 -> vector<4x256xf32>
    %cst_33 = arith.constant 0xFF800000 : f32
    %113 = vector.shape_cast %5 : vector<1x256xi1> to vector<1x256xi1>
    %114 = vector.broadcast %113 : vector<1x256xi1> to vector<4x256xi1>
    %115 = vector.broadcast %cst_33 : f32 to vector<4x256xf32>
    %116 = arith.select %114, %112, %115 : vector<4x256xi1>, vector<4x256xf32>
    %c1_i32_34 = arith.constant 1 : i32
    %117 = tpu.dynamic_rotate %110 by %c1_i32_34 dim 1 : vector<4x256xf32>, i32 -> vector<4x256xf32>
    %cst_35 = arith.constant 0xFF800000 : f32
    %118 = vector.shape_cast %6 : vector<1x256xi1> to vector<1x256xi1>
    %119 = vector.broadcast %118 : vector<1x256xi1> to vector<4x256xi1>
    %120 = vector.broadcast %cst_35 : f32 to vector<4x256xf32>
    %121 = arith.select %119, %117, %120 : vector<4x256xi1>, vector<4x256xf32>
    %c254_i32_36 = arith.constant 254 : i32
    %122 = tpu.dynamic_rotate %110 by %c254_i32_36 dim 1 : vector<4x256xf32>, i32 -> vector<4x256xf32>
    %cst_37 = arith.constant 0xFF800000 : f32
    %123 = vector.shape_cast %9 : vector<1x256xi1> to vector<1x256xi1>
    %124 = vector.broadcast %123 : vector<1x256xi1> to vector<4x256xi1>
    %125 = vector.broadcast %cst_37 : f32 to vector<4x256xf32>
    %126 = arith.select %124, %122, %125 : vector<4x256xi1>, vector<4x256xf32>
    %c2_i32_38 = arith.constant 2 : i32
    %127 = tpu.dynamic_rotate %110 by %c2_i32_38 dim 1 : vector<4x256xf32>, i32 -> vector<4x256xf32>
    %cst_39 = arith.constant 0xFF800000 : f32
    %128 = vector.shape_cast %10 : vector<1x256xi1> to vector<1x256xi1>
    %129 = vector.broadcast %128 : vector<1x256xi1> to vector<4x256xi1>
    %130 = vector.broadcast %cst_39 : f32 to vector<4x256xf32>
    %131 = arith.select %129, %127, %130 : vector<4x256xi1>, vector<4x256xf32>
    %132 = arith.maximumf %110, %116 : vector<4x256xf32>
    %133 = arith.maximumf %121, %126 : vector<4x256xf32>
    %134 = arith.maximumf %132, %133 : vector<4x256xf32>
    %135 = arith.maximumf %134, %131 : vector<4x256xf32>
    %c240_i32_40 = arith.constant 240 : i32
    %136 = tpu.dynamic_rotate %135 by %c240_i32_40 dim 1 : vector<4x256xf32>, i32 -> vector<4x256xf32>
    %cst_41 = arith.constant 0xFF800000 : f32
    %137 = vector.shape_cast %7 : vector<1x256xi1> to vector<1x256xi1>
    %138 = vector.broadcast %137 : vector<1x256xi1> to vector<4x256xi1>
    %139 = vector.broadcast %cst_41 : f32 to vector<4x256xf32>
    %140 = arith.select %138, %136, %139 : vector<4x256xi1>, vector<4x256xf32>
    %c16_i32_42 = arith.constant 16 : i32
    %141 = tpu.dynamic_rotate %135 by %c16_i32_42 dim 1 : vector<4x256xf32>, i32 -> vector<4x256xf32>
    %cst_43 = arith.constant 0xFF800000 : f32
    %142 = vector.shape_cast %8 : vector<1x256xi1> to vector<1x256xi1>
    %143 = vector.broadcast %142 : vector<1x256xi1> to vector<4x256xi1>
    %144 = vector.broadcast %cst_43 : f32 to vector<4x256xf32>
    %145 = arith.select %143, %141, %144 : vector<4x256xi1>, vector<4x256xf32>
    %c224_i32_44 = arith.constant 224 : i32
    %146 = tpu.dynamic_rotate %135 by %c224_i32_44 dim 1 : vector<4x256xf32>, i32 -> vector<4x256xf32>
    %cst_45 = arith.constant 0xFF800000 : f32
    %147 = vector.shape_cast %11 : vector<1x256xi1> to vector<1x256xi1>
    %148 = vector.broadcast %147 : vector<1x256xi1> to vector<4x256xi1>
    %149 = vector.broadcast %cst_45 : f32 to vector<4x256xf32>
    %150 = arith.select %148, %146, %149 : vector<4x256xi1>, vector<4x256xf32>
    %c32_i32_46 = arith.constant 32 : i32
    %151 = tpu.dynamic_rotate %135 by %c32_i32_46 dim 1 : vector<4x256xf32>, i32 -> vector<4x256xf32>
    %cst_47 = arith.constant 0xFF800000 : f32
    %152 = vector.shape_cast %12 : vector<1x256xi1> to vector<1x256xi1>
    %153 = vector.broadcast %152 : vector<1x256xi1> to vector<4x256xi1>
    %154 = vector.broadcast %cst_47 : f32 to vector<4x256xf32>
    %155 = arith.select %153, %151, %154 : vector<4x256xi1>, vector<4x256xf32>
    %156 = arith.maximumf %135, %140 : vector<4x256xf32>
    %157 = arith.maximumf %145, %150 : vector<4x256xf32>
    %158 = arith.maximumf %156, %157 : vector<4x256xf32>
    %159 = arith.maximumf %158, %155 : vector<4x256xf32>
    %c12 = arith.constant 12 : index
    %c0_48 = arith.constant 0 : index
    %160 = vector.load %arg8[%c12, %c0_48] : memref<16x256xf32, #tpu.memory_space<vmem>>, vector<4x256xf32>
    tpu.vector_store %arg8[%c12, %c0_48], %159 {strides = array<i32>} : memref<16x256xf32, #tpu.memory_space<vmem>>, vector<4x256xf32>,
    %c0_49 = arith.constant 0 : index
    %c0_50 = arith.constant 0 : index
    %c0_51 = arith.constant 0 : index
    %161 = vector.load %arg5[%c0_49, %c0_50, %c0_51] : memref<1x4x16xf32, #tpu.memory_space<vmem>>, vector<1x4x16xf32>
    %162 = vector.shape_cast %161 : vector<1x4x16xf32> to vector<4x16xf32>
    %c0_52 = arith.constant 0 : index
    %c0_53 = arith.constant 0 : index
    %163 = vector.load %arg8[%c0_52, %c0_53] : memref<16x256xf32, #tpu.memory_space<vmem>>, vector<16x256xf32>
    %cst_54 = arith.constant dense<0.000000e+00> : vector<4x256xf32>
    %164 = tpu.matmul %162, %163, %cst_54 {dimension_numbers = #tpu.dot_dimension_numbers<[1], [0], [0], [1], [0, 0, 1, 1], [], []>} : vector<4x16xf32>, vector<16x256xf32>, vector<4x256xf32> -> vector<4x256xf32>
    %c0_55 = arith.constant 0 : index
    %c0_56 = arith.constant 0 : index
    %165 = vector.load %arg6[%c0_55, %c0_56] : memref<4x1xf32, #tpu.memory_space<vmem>>, vector<4x1xf32>
    %166 = vector.broadcast %165 : vector<4x1xf32> to vector<4x256xf32>
    %167 = arith.addf %164, %166 : vector<4x256xf32>
    %c0_57 = arith.constant 0 : index
    %c0_58 = arith.constant 0 : index
    %c0_59 = arith.constant 0 : index
    %168 = vector.load %arg7[%c0_57, %c0_58, %c0_59] : memref<1x4x256xf32, #tpu.memory_space<vmem>>, vector<1x4x256xf32>
    %169 = vector.shape_cast %168 : vector<1x4x256xf32> to vector<4x256xf32>
    %170 = vector.shape_cast %167 : vector<4x256xf32> to vector<1x4x256xf32>
    tpu.vector_store %arg7[%c0_57, %c0_58, %c0_59], %170 {strides = array<i32>} : memref<1x4x256xf32, #tpu.memory_space<vmem>>, vector<1x4x256xf32>,
    return
  }
  func.func @transform_0(%arg0: i32, %arg1: i32, %arg2: i32) -> (i32, i32) {
    %c0_i32 = arith.constant 0 : i32
    %c0_i32_0 = arith.constant 0 : i32
    %c0_i32_1 = arith.constant 0 : i32
    return %c0_i32, %c0_i32_0 : i32, i32
  }
  func.func @transform_1(%arg0: i32, %arg1: i32, %arg2: i32) -> (i32, i32, i32) {
    %c0_i32 = arith.constant 0 : i32
    %c0_i32_0 = arith.constant 0 : i32
    return %arg0, %arg2, %c0_i32 : i32, i32, i32
  }
  func.func @transform_2(%arg0: i32, %arg1: i32, %arg2: i32) -> (i32, i32, i32) {
    %c0_i32 = arith.constant 0 : i32
    %c0_i32_0 = arith.constant 0 : i32
    return %arg2, %arg1, %c0_i32 : i32, i32, i32
  }
  func.func @transform_3(%arg0: i32, %arg1: i32, %arg2: i32) -> (i32, i32) {
    %c0_i32 = arith.constant 0 : i32
    %c0_i32_0 = arith.constant 0 : i32
    return %arg1, %c0_i32 : i32, i32
  }
  func.func @transform_4(%arg0: i32, %arg1: i32, %arg2: i32) -> (i32, i32, i32) {
    %c0_i32 = arith.constant 0 : i32
    %c0_i32_0 = arith.constant 0 : i32
    return %arg0, %arg1, %c0_i32 : i32, i32, i32
  }
}

</mosaic_0001>

<bundles_post_ra>
// kernel: tpu_custom_call.1
= control target key start
LH: loop header
LB: loop body
LE: loop exit
PB: predicated region body
PF: predicated region fallthrough
CT: control target
= control target key end

     0   :  { %9 = vsyncpa [#allocation4], 0  ;;  %s3272_s0 = inlined_call_operand.hbm [shape: f32[8,256], index: 0, kind: input, shape index: {}]   ;;  %s3273_s1 = inlined_call_operand.hbm [shape: f32[2,4,256], index: 1, kind: input, shape index: {}]   ;;  %s3274_s2 = inlined_call_operand.vmem [shape: f32[1,4,16], index: 2, kind: input, shape index: {}]   ;;  %s3275_s3 = inlined_call_operand.vmem [shape: f32[4,1], index: 3, kind: input, shape index: {}]   ;;  %s3276_s4 = inlined_call_operand.hbm [shape: f32[2,4,256], index: 4, kind: output, shape index: {}]  }
   0x1   :  { %10 = vsyncpa [#allocation7], 0 }
   0x2   :  { %12 = vsyncpa [#allocation7 + $0x1], 0 }
   0x3   :  { %13 = vsyncpa [#allocation5], 0 }
   0x4   :  { %15 = vsyncpa [#allocation5 + $0x1], 0  ;;  %s2238_s15 = smov 0   ;;  %s2240_s16 = smov 0  }
   0x5   :  { %s2242_s17 = smov 0   ;;  %s2244_s18 = smov 0  }
   0x6   :  { %s2246_s19 = smov 0   ;;  %s2248_s20 = smov 0  }
   0x7 LB: > { %s1943_s21 = sadd.s32 4294967295, %s2198_s20   ;;  %s1944_s22 = sadd.s32 4294967294, %s2198_s20   ;;  %s2198_s20 = sphi %s2248_s20, %s21_s20   ;;  %s2194_s19 = sphi %s2246_s19, %s3301_s19   ;;  %s2190_s18 = sphi %s2244_s18, %s3300_s18   ;;  %s2186_s17 = sphi %s2242_s17, %s3299_s17   ;;  %s2182_s16 = sphi %s2240_s16, %s3298_s16   ;;  %s2178_s15 = sphi %s2238_s15, %s3297_s15  }
   0x8   : > { %p83_p0 = scmp.ne.s32.totalorder %s2182_s16, %s2178_s15  ;;  %p2272_p1 = scmp.eq.s32.totalorder %s1943_s21, 0 }
   0x9   : > { %p2276_p2 = scmp.eq.s32.totalorder %s1943_s21, 1  ;;  %p169_p3 = scmp.eq.s32.totalorder %s1944_s22, 1 }
   0xa   : > { %s3281_s23 = scalar_select %p2272_p1, 1, 0 }
   0xb   : > { %s3282_s24 = scalar_select %p2276_p2, 1, 0 }
   0xc   : > { %p2282_p4 = por %p2272_p1, %p83_p0  ;;  %p1945_p5 = scmp.ge.s32.totalorder %s2198_s20, 1 }
   0xd   : > { %p2287_p6 = por %p169_p3, %p83_p0  ;;  %p176_p7 = scmp.lt.s32.totalorder %s2198_s20, 3 }
   0xe   : > { %s3283_s25 = scalar_select %p2282_p4, 1, 0 }
   0xf   : > { %s3284_s26 = scalar_select %p2287_p6, 1, 0 }
  0x10   : > { %p2292_p8 = pnand %p1945_p5, %p176_p7  ;;  %s2200_s28 = smov [#allocation3]  }
  0x11   : > { %s189_s29 = sshll.u32 %s2200_s28, 4  ;;  %s40_s5 = sadd.s32 1, %s2194_s19  ;;  %s190_s29 = int_to_ptr.vmem [resolvable:$true] %s189_s29 }
  0x12   : > { %s3285_s27 = scalar_select %p2292_p8, 1, 0 }
  0x13   : > { %p1977_p10 = pneg %p2292_p8  ;;  %s70_s6 = sadd.s32 1, %s2186_s17 }
  0x14   : > { %p2307_p12 = scmp.ge.s32.totalorder %s40_s5, 2  ;;  %s2054_s10 = scalar_lea.hbm %s3272_s0, 256 }
  0x15   : > { %p2301_p11 = pnand %p1977_p10, %p2272_p1  ;;  %p2055_p13 = scmp.ne.s32.totalorder %s3272_s0, %s2054_s10 }
  0x16   : > { %s3287_s7 = scalar_select %p2307_p12, 1, 0 }
  0x17   : > { %p2056_p0 = pneg %p2301_p11  ;;  %p2061_p7 = scmp.lt.u32.totalorder %s2054_s10, %s3272_s0 }
  0x19   : > { %p2057_p3 = pnand %p2056_p0, %p2055_p13 }
  0x1b   : > { %p2058_p5 = pneg %p2057_p3 }
  0x1d   : > { %p2063_p10 = pnand %p2061_p7, %p2058_p5 }
  0x1f   : > { %2066 = shalt.err (!%p2063_p10)
}
  0x20   : > { %s2067_s21 = scalar_lea.vmem %s190_s29, 256  ;;  %p2075_p1 = scmp.lt.s32.totalorder %s190_s29, %s190_s29 }
  0x21   : > { %p2068_p9 = scmp.ne.s32.totalorder %s190_s29, %s2067_s21  ;;  %p2076_p8 = scmp.lt.s32.totalorder %s2067_s21, %s2067_s21 }
  0x23   : > { %p2070_p6 = pnand %p2068_p9, %p2056_p0  ;;  %p2077_p2 = por %p2076_p8, %p2075_p1 }
  0x25   : > { %p2071_p4 = pneg %p2070_p6 }
  0x27   : > { %p2078_p12 = pnand %p2077_p2, %p2071_p4 }
  0x29   : > { %2081 = shalt.err (!%p2078_p12)
}
  0x2a   : > { %1980 = dma.hbm_to_vmem [thread:$0]  (!%p2301_p11), %s3272_s0, 256, %s190_s29, [#allocation4]  }
  0x2b   : > { %p3288_p1 = scmp.ne.s32.totalorder %s3287_s7, 0  ;;  %p77_p2 = scmp.ne.s32.totalorder %s2186_s17, %s2182_s16 }
  0x2c   : > { %p78_p4 = scmp.eq.s32.totalorder %s2198_s20, 0  ;;  %p1990_p6 = scmp.lt.s32.totalorder %s2198_s20, 2 }
  0x2d   : > { %s3303_s5 = smov (%p3288_p1, %s40_s5), 0  ;;  %p3289_p12 = scmp.ne.s32.totalorder %s3282_s24, 0 }
  0x2e   : > { %s65_s30 = ssub.s32 %s2194_s19, %s3303_s5  ;;  %p79_p9 = por %p78_p4, %p77_p2 }
  0x2f   : > { %p68_p8 = scmp.eq.s32.totalorder %s65_s30, 0  ;;  %p2339_p13 = por %p3289_p12, %p77_p2 }
  0x30   : > { %s217_s9 = sand.u32 1, %s2186_s17   ;;  %s1963_s7 = sshll.u32 %s2194_s19, 7 }
  0x31   : > { %s2347_s10 = scalar_select %p68_p8, %s2186_s17, %s70_s6  }
  0x32   : > { %s1950_s29 = sshll.u32 %s217_s9, 3  ;;  %s2353_s13 = scalar_lea.hbm %s3273_s1, %s1963_s7 }
  0x33   : > { %s221_s24 = scalar_lea.vmem [#allocation6], %s1950_s29  ;;  %p2357_p11 = pnand %p1990_p6, %p79_p9 }
  0x34   : > { %s231_s14 = sshll.u32 %s221_s24, 4  ;;  %s218_s6 = scalar_lea.sflag [#allocation7], %s217_s9  ;;  %s2355_s14 = int_to_ptr.vmem [resolvable:$true] %s231_s14 }
  0x35   : > { %s2082_s22 = scalar_lea.hbm %s2353_s13, 128  ;;  %p2084_p3 = pneg %p2357_p11 }
  0x36   : > { %p2083_p0 = scmp.ne.s32.totalorder %s2353_s13, %s2082_s22  ;;  %s2087_s29 = scalar_lea.hbm %s3273_s1, 256 }
  0x37   : > { %p2088_p10 = scmp.lt.u32.totalorder %s2353_s13, %s3273_s1  ;;  %p2089_p1 = scmp.lt.u32.totalorder %s2087_s29, %s2082_s22 }
  0x38   : > { %p2085_p5 = pnand %p2084_p3, %p2083_p0  ;;  %p2091_p4 = scmp.lt.u32.totalorder %s2082_s22, %s2353_s13 }
  0x39   : > { %p2090_p2 = por %p2089_p1, %p2088_p10 }
  0x3a   : > { %p2086_p7 = pneg %p2085_p5 }
  0x3b   : > { %p2092_p6 = por %p2091_p4, %p2090_p2 }
  0x3d   : > { %p2093_p8 = pnand %p2092_p6, %p2086_p7 }
  0x3f   : > { %2096 = shalt.err (!%p2093_p8)
}
  0x40   : > { %s2097_s9 = scalar_lea.vmem %s2355_s14, 128  ;;  %s2201_s12 = smov [#allocation6]  }
  0x41   : > { %p2098_p9 = scmp.ne.s32.totalorder %s2355_s14, %s2097_s9  ;;  %s2102_s24 = sshll.u32 %s2201_s12, 4  ;;  %s2103_s24 = int_to_ptr.vmem [resolvable:$false] %s2102_s24 }
  0x42   : > { %s2104_s28 = scalar_lea.vmem %s2103_s24, 256  ;;  %p2105_p5 = scmp.lt.s32.totalorder %s2355_s14, %s2103_s24 }
  0x43   : > { %p2100_p12 = pnand %p2098_p9, %p2084_p3  ;;  %p2106_p10 = scmp.lt.s32.totalorder %s2104_s28, %s2097_s9 }
  0x45   : > { %p2101_p0 = pneg %p2100_p12  ;;  %p2107_p1 = por %p2106_p10, %p2105_p5 }
  0x47   : > { %p2108_p2 = pnand %p2107_p1, %p2101_p0 }
  0x49   : > { %2111 = shalt.err (!%p2108_p2)
}
  0x4a   : > { %1984 = dma.hbm_to_vmem [thread:$0]  (!%p2357_p11), %s2353_s13, 128, %s2355_s14, %s218_s6  }
  0x4b   : > { %p3292_p7 = scmp.ne.s32.totalorder %s3285_s27, 0 }
  0x4c   : > { %p3293_p3 = scmp.ne.s32.totalorder (!%p3292_p7), %s3281_s23, 0 }
  0x4d   : > { %240 = sbr.rel (%p3292_p7) target bundleno = 1270 (0x4f6), region = 36 }
  0x54   : > { %2165 = dma.done.wait (%p3293_p3), [#allocation4], 256  }
  0x55   : > { %2167 = vsyncadd (%p3293_p3), [#allocation4], 4294967040  ;;  %s2393_s22 = sand.u32 1, %s2182_s16   ;;  %p3294_p11 = scmp.ne.s32.totalorder %s3283_s25, 0 }
  0x56   : > { %s1955_s21 = sshll.u32 %s2393_s22, 3  ;;  %s247_s30 = scalar_lea.sflag [#allocation7], %s2393_s22 }
  0x57   : > { %s250_s13 = scalar_lea.vmem [#allocation6], %s1955_s21 }
  0x58   : > { %2169 = dma.done.wait (%p3294_p11), %s247_s30, 128  }
  0x59   : > { %2171 = vsyncadd (%p3294_p11), %s247_s30, 4294967168  ;;  %v2403_v0 = vld [vmem:[%s250_s13] sm:$0xff]  ;;  %s2202_s23 = smov 127   ;;  %s2203_s27 = smov 126   ;;  %v311_v2 = vlaneseq  ;;  %v2422_v6 = vld [vmem:[#allocation3] sm:$0xff]  ;;  %vm454_vm2 = vcmask 1041409  }
  0x5a   : > { %307 = vrot.lane.b32.xlu1 %v2403_v0, %s2202_s23  ;;  %305 = vst [vmem:[#allocation2] sm:$0xf] %v2403_v0  ;;  %375 = vrot.lane.b32.xlu0 %v2403_v0, %s2203_s27  ;;  %v303_v1 = vcombine.high %v2403_v0, %v2403_v0  ;;  %s2204_s25 = smov 1   ;;  %s2205_s14 = smov 2   ;;  %v2424_v7 = vld [vmem:[#allocation3 + $0x8] sm:$0xff]  ;;  %vm300_vm3 = vcmp.ne.f32.partialorder %v2422_v6, 0.0 }
  0x5b   : > { %v2420_v3 = vand.u32 127, %v311_v2  ;;  %vm301_vm4 = vcmp.ne.f32.partialorder %v2424_v7, 0.0  ;;  %vm456_vm5 = vcmask 1045509   ;;  %vm459_vm6 = vcmask 1042434   ;;  %s2206_s6 = smov 96   ;;  %s2207_s29 = smov 112  }
  0x5c   : > { %306 = vst [vmem:[#allocation2 + $0x8] sm:$0xf] %v303_v1  ;;  %vm461_vm7 = vcmask 1046534   ;;  %vm464_vm8 = vcmask 1043459   ;;  %vm466_vm11 = vcmask 1047559   ;;  %s2208_s7 = smov 16  }
  0x5d   : > { %vm313_vm0 = vcmp.lt.s32.totalorder %v2420_v3, 127  ;;  %vm379_vm1 = vcmp.lt.s32.totalorder %v2420_v3, 126  ;;  %vm348_vm9 = vcmp.lt.s32.totalorder %v2420_v3, 1  ;;  %vm412_vm10 = vcmp.lt.s32.totalorder %v2420_v3, 2  ;;  %s2209_s11 = smov 32   ;;  %s1964_s30 = sshll.u32 %s2190_s18, 7 }
  0x5e   : > { %309 = vrot.lane.b32.xlu1 %v303_v1, %s2202_s23  ;;  %377 = vrot.lane.b32.xlu0 %v303_v1, %s2203_s27  ;;  %vm617_vm12 = vcmp.lt.s32.totalorder %v2420_v3, 96  ;;  %vm555_vm13 = vcmp.lt.s32.totalorder %v2420_v3, 112  ;;  %vm586_vm14 = vcmp.lt.s32.totalorder %v2420_v3, 16  ;;  %vm650_vm15 = vcmp.lt.s32.totalorder %v2420_v3, 32  ;;  %s285_s13 = scalar_lea.vmem [#allocation8], %s1955_s21  ;;  %s2212_s18 = smov [#allocation8]  }
  0x5f   : > { %s2116_s21 = sshll.u32 %s2212_s18, 4  ;;  %s2117_s21 = int_to_ptr.vmem [resolvable:$false] %s2116_s21 }
  0x62   : > { %346 = vrot.lane.b32.xlu1 %v303_v1, %s2204_s25  ;;  %344 = vrot.lane.b32.xlu0 %v2403_v0, %s2204_s25 }
  0x66   : > { %410 = vrot.lane.b32.xlu1 %v303_v1, %s2205_s14  ;;  %408 = vrot.lane.b32.xlu0 %v2403_v0, %s2205_s14 }
  0xcc   : > { %v308_v4 = vpop.permute.xlu1 %307  ;;  %v376_v5 = vpop.permute.xlu0 %375 }
  0xd0   : > { %v310_v8 = vpop.permute.xlu1 %309  ;;  %v378_v9 = vpop.permute.xlu0 %377 }
  0xd1   : > { %v314_v10 = vsel %vm313_vm0, %v308_v4, %v310_v8  ;;  %v315_v11 = vsel %vm313_vm0, %v310_v8, %v308_v4  ;;  %v380_v12 = vsel %vm379_vm1, %v376_v5, %v378_v9  ;;  %v381_v13 = vsel %vm379_vm1, %v378_v9, %v376_v5 }
  0xd2   : > { %v322_v14 = vrot.slane %v314_v10, 1  ;;  %v323_v15 = vrot.slane %v315_v11, 1  ;;  %v324_v16 = vrot.slane %v314_v10, 2  ;;  %v325_v17 = vrot.slane %v315_v11, 2 }
  0xd3   : > { %v326_v18 = vrot.slane %v314_v10, 3  ;;  %v327_v19 = vrot.slane %v315_v11, 3  ;;  %v336_v20 = vsel %vm300_vm3, %v314_v10, -inf  ;;  %v337_v21 = vsel %vm301_vm4, %v315_v11, -inf }
  0xd4   : > { %v338_v22 = vsel %vm300_vm3, %v322_v14, -inf  ;;  %v339_v23 = vsel %vm301_vm4, %v323_v15, -inf  ;;  %v340_v24 = vsel %vm300_vm3, %v324_v16, -inf  ;;  %v341_v25 = vsel %vm301_vm4, %v325_v17, -inf  ;;  %v347_v53 = vpop.permute.xlu1 %346  ;;  %v345_v54 = vpop.permute.xlu0 %344 }
  0xd5   : > { %v342_v26 = vsel %vm300_vm3, %v326_v18, -inf  ;;  %v343_v27 = vsel %vm301_vm4, %v327_v19, -inf  ;;  %v449_v28 = vcombine.low %v336_v20, %v337_v21  ;;  %v450_v29 = vcombine.low %v338_v22, %v339_v23 }
  0xd6   : > { %v451_v30 = vcombine.low %v340_v24, %v341_v25  ;;  %v452_v31 = vcombine.low %v342_v26, %v343_v27  ;;  %v384_v32 = vrot.slane %v380_v12, 4  ;;  %v385_v33 = vrot.slane %v381_v13, 4 }
  0xd7   : > { %v453_v34 = vrot.slane %v450_v29, 7  ;;  %v386_v35 = vrot.slane %v380_v12, 5  ;;  %v387_v36 = vrot.slane %v381_v13, 5  ;;  %v388_v37 = vrot.slane %v380_v12, 6 }
  0xd8   : > { %v458_v38 = vrot.slane %v451_v30, 6  ;;  %v389_v39 = vrot.slane %v381_v13, 6  ;;  %v390_v40 = vrot.slane %v380_v12, 7  ;;  %v2456_v42 = vrot.slane %v452_v31, 5  ;;  %v411_v22 = vpop.permute.xlu1 %410  ;;  %v409_v23 = vpop.permute.xlu0 %408 }
  0xd9   : > { %v455_v41 = vsel %vm454_vm2, %v453_v34, %v449_v28  ;;  %v391_v43 = vrot.slane %v381_v13, 7  ;;  %v400_v44 = vsel %vm300_vm3, %v384_v32, -inf  ;;  %v401_v46 = vsel %vm301_vm4, %v385_v33, -inf }
  0xda   : > { %v457_v45 = vsel %vm456_vm5, %v453_v34, %v455_v41  ;;  %v402_v47 = vsel %vm300_vm3, %v386_v35, -inf  ;;  %v403_v48 = vsel %vm301_vm4, %v387_v36, -inf  ;;  %v404_v50 = vsel %vm300_vm3, %v388_v37, -inf }
  0xdb   : > { %v460_v49 = vsel %vm459_vm6, %v458_v38, %v457_v45  ;;  %v405_v51 = vsel %vm301_vm4, %v389_v39, -inf  ;;  %v406_v52 = vsel %vm300_vm3, %v390_v40, -inf  ;;  %v407_v56 = vsel %vm301_vm4, %v391_v43, -inf }
  0xdc   : > { %v462_v55 = vsel %vm461_vm7, %v458_v38, %v460_v49  ;;  %v478_v57 = vrot.slane %v400_v44, 3  ;;  %v479_v59 = vrot.slane %v401_v46, 3  ;;  %v480_v60 = vrot.slane %v402_v47, 3 }
  0xdd   : > { %v2480_v58 = vsel %vm464_vm8, %v2456_v42, %v462_v55  ;;  %v481_v61 = vrot.slane %v403_v48, 3  ;;  %v482_v62 = vrot.slane %v404_v50, 3  ;;  %v483_v63 = vrot.slane %v405_v51, 3 }
  0xde   : > { %v484_v1 = vrot.slane %v406_v52, 3  ;;  %v349_v2 = vsel %vm348_vm9, %v345_v54, %v347_v53  ;;  %v485_v4 = vrot.slane %v407_v56, 3  ;;  %v350_v5 = vsel %vm348_vm9, %v347_v53, %v345_v54 }
  0xdf   : > { %v354_v8 = vrot.slane %v349_v2, 7  ;;  %v356_v9 = vrot.slane %v349_v2, 1  ;;  %v353_v10 = vrot.slane %v350_v5, 7  ;;  %v355_v11 = vrot.slane %v350_v5, 1 }
  0xe0   : > { %v357_v12 = vrot.slane %v350_v5, 2  ;;  %v358_v13 = vrot.slane %v349_v2, 2  ;;  %v369_v15 = vsel %vm300_vm3, %v350_v5, -inf  ;;  %v370_v16 = vsel %vm301_vm4, %v349_v2, -inf }
  0xe1   : > { %v368_v14 = vsel %vm301_vm4, %v354_v8, -inf  ;;  %v372_v17 = vsel %vm301_vm4, %v356_v9, -inf  ;;  %v367_v18 = vsel %vm300_vm3, %v353_v10, -inf  ;;  %v371_v19 = vsel %vm300_vm3, %v355_v11, -inf }
  0xe2   : > { %v373_v20 = vsel %vm300_vm3, %v357_v12, -inf  ;;  %v374_v21 = vsel %vm301_vm4, %v358_v13, -inf  ;;  %v494_v24 = vmax.f32 %v367_v18, %v478_v57  ;;  %v495_v25 = vmax.f32 %v368_v14, %v479_v59 }
  0xe3   : > { %v496_v26 = vmax.f32 %v369_v15, %v480_v60  ;;  %v497_v27 = vmax.f32 %v370_v16, %v481_v61  ;;  %v498_v28 = vmax.f32 %v371_v19, %v482_v62  ;;  %v499_v29 = vmax.f32 %v372_v17, %v483_v63 }
  0xe4   : > { %v500_v30 = vmax.f32 %v373_v20, %v484_v1  ;;  %v501_v31 = vmax.f32 %v374_v21, %v485_v4  ;;  %v510_v32 = vcombine.low %v494_v24, %v495_v25  ;;  %v413_v34 = vsel %vm412_vm10, %v409_v23, %v411_v22 }
  0xe5   : > { %v511_v33 = vcombine.low %v496_v26, %v497_v27  ;;  %v414_v35 = vsel %vm412_vm10, %v411_v22, %v409_v23  ;;  %v512_v36 = vcombine.low %v498_v28, %v499_v29  ;;  %v418_v39 = vrot.slane %v413_v34, 3 }
  0xe6   : > { %v513_v37 = vcombine.low %v500_v30, %v501_v31  ;;  %v417_v38 = vrot.slane %v414_v35, 3  ;;  %v514_v40 = vrot.slane %v510_v32, 1  ;;  %v419_v41 = vrot.slane %v414_v35, 4 }
  0xe7   : > { %v420_v43 = vrot.slane %v413_v34, 4  ;;  %v421_v44 = vrot.slane %v414_v35, 5  ;;  %v517_v45 = vrot.slane %v512_v36, 7  ;;  %v422_v47 = vrot.slane %v413_v34, 5 }
  0xe8   : > { %v520_v46 = vrot.slane %v513_v37, 6  ;;  %v423_v48 = vrot.slane %v414_v35, 6  ;;  %v515_v49 = vsel %vm454_vm2, %v511_v33, %v514_v40  ;;  %v424_v50 = vrot.slane %v413_v34, 6 }
  0xe9   : > { %v433_v51 = vsel %vm300_vm3, %v417_v38, -inf  ;;  %v434_v52 = vsel %vm301_vm4, %v418_v39, -inf  ;;  %v516_v53 = vsel %vm456_vm5, %v511_v33, %v515_v49  ;;  %v435_v54 = vsel %vm300_vm3, %v419_v41, -inf }
  0xea   : > { %v436_v55 = vsel %vm301_vm4, %v420_v43, -inf  ;;  %v437_v56 = vsel %vm300_vm3, %v421_v44, -inf  ;;  %v518_v57 = vsel %vm459_vm6, %v517_v45, %v516_v53  ;;  %v438_v59 = vsel %vm301_vm4, %v422_v47, -inf }
  0xeb   : > { %v439_v60 = vsel %vm300_vm3, %v423_v48, -inf  ;;  %v440_v61 = vsel %vm301_vm4, %v424_v50, -inf  ;;  %v519_v62 = vsel %vm461_vm7, %v517_v45, %v518_v57  ;;  %v533_v63 = vcombine.high %v433_v51, %v434_v52 }
  0xec   : > { %v535_v1 = vcombine.high %v437_v56, %v438_v59  ;;  %v467_v2 = vsel %vm466_vm11, %v2456_v42, %v2480_v58  ;;  %v521_v4 = vsel %vm464_vm8, %v520_v46, %v519_v62  ;;  %v534_v5 = vcombine.high %v435_v54, %v436_v55 }
  0xed   : > { %v536_v8 = vcombine.high %v439_v60, %v440_v61  ;;  %v537_v9 = vrot.slane %v533_v63, 1  ;;  %v522_v10 = vsel %vm466_vm11, %v520_v46, %v521_v4  ;;  %v469_v11 = vmax.f32 %v2403_v0, %v467_v2 }
  0xee   : > { %v540_v13 = vrot.slane %v535_v1, 7 }
  0xef   : > { %v538_v12 = vsel %vm454_vm2, %v534_v5, %v537_v9  ;;  %v524_v15 = vmax.f32 %v469_v11, %v522_v10  ;;  %v543_v17 = vrot.slane %v536_v8, 6 }
  0xf0   : > { %v539_v14 = vsel %vm456_vm5, %v534_v5, %v538_v12 }
  0xf1   : > { %v541_v16 = vsel %vm459_vm6, %v540_v13, %v539_v14 }
  0xf2   : > { %v542_v42 = vsel %vm461_vm7, %v540_v13, %v541_v16 }
  0xf3   : > { %v544_v58 = vsel %vm464_vm8, %v543_v17, %v542_v42 }
  0xf4   : > { %v545_v18 = vsel %vm466_vm11, %v543_v17, %v544_v58 }
  0xf5   : > { %v2538_v19 = vmax.f32 %v524_v15, %v545_v18 }
  0xf7   : > { %613 = vrot.lane.b32.xlu0 %v2538_v19, %s2206_s6  ;;  %v549_v0 = vcombine.high %v2538_v19, %v2538_v19 }
  0xf9   : > { %615 = vrot.lane.b32.xlu1 %v549_v0, %s2206_s6 }
  0xfb   : > { %551 = vrot.lane.b32.xlu0 %v2538_v19, %s2207_s29 }
  0xfd   : > { %553 = vrot.lane.b32.xlu1 %v549_v0, %s2207_s29 }
  0xff   : > { %582 = vrot.lane.b32.xlu0 %v2538_v19, %s2208_s7 }
 0x101   : > { %584 = vrot.lane.b32.xlu1 %v549_v0, %s2208_s7 }
 0x103   : > { %646 = vrot.lane.b32.xlu0 %v2538_v19, %s2209_s11 }
 0x105   : > { %648 = vrot.lane.b32.xlu1 %v549_v0, %s2209_s11 }
 0x169   : > { %v614_v20 = vpop.permute.xlu0 %613 }
 0x16b   : > { %v616_v21 = vpop.permute.xlu1 %615 }
 0x16c   : > { %v618_v22 = vsel %vm617_vm12, %v614_v20, %v616_v21  ;;  %v619_v23 = vsel %vm617_vm12, %v616_v21, %v614_v20 }
 0x16d   : > { %v622_v24 = vrot.slane %v618_v22, 2  ;;  %v623_v25 = vrot.slane %v619_v23, 2  ;;  %v624_v26 = vrot.slane %v618_v22, 3  ;;  %v625_v27 = vrot.slane %v619_v23, 3  ;;  %v552_v41 = vpop.permute.xlu0 %551 }
 0x16e   : > { %v626_v28 = vrot.slane %v618_v22, 4  ;;  %v627_v29 = vrot.slane %v619_v23, 4  ;;  %v628_v30 = vrot.slane %v618_v22, 5  ;;  %v629_v31 = vrot.slane %v619_v23, 5 }
 0x16f   : > { %v2561_v32 = vsel %vm300_vm3, %v622_v24, -inf  ;;  %v2565_v33 = vsel %vm301_vm4, %v623_v25, -inf  ;;  %v2569_v34 = vsel %vm300_vm3, %v624_v26, -inf  ;;  %v2573_v35 = vsel %vm301_vm4, %v625_v27, -inf  ;;  %v554_v36 = vpop.permute.xlu1 %553 }
 0x170   : > { %v2577_v37 = vsel %vm300_vm3, %v626_v28, -inf  ;;  %v2581_v38 = vsel %vm301_vm4, %v627_v29, -inf  ;;  %v2586_v39 = vsel %vm300_vm3, %v628_v30, -inf  ;;  %v2590_v40 = vsel %vm301_vm4, %v629_v31, -inf }
 0x171   : > { %v710_v43 = vrot.slane %v2561_v32, 3  ;;  %v711_v44 = vrot.slane %v2565_v33, 3  ;;  %v712_v45 = vrot.slane %v2569_v34, 3  ;;  %v713_v46 = vrot.slane %v2573_v35, 3  ;;  %v583_v9 = vpop.permute.xlu0 %582 }
 0x172   : > { %v714_v47 = vrot.slane %v2577_v37, 3  ;;  %v715_v48 = vrot.slane %v2581_v38, 3  ;;  %v556_v49 = vsel %vm555_vm13, %v552_v41, %v554_v36  ;;  %v557_v50 = vsel %vm555_vm13, %v554_v36, %v552_v41 }
 0x173   : > { %v560_v51 = vrot.slane %v556_v49, 6  ;;  %v561_v52 = vrot.slane %v557_v50, 6  ;;  %v562_v53 = vrot.slane %v556_v49, 7  ;;  %v563_v54 = vrot.slane %v557_v50, 7  ;;  %v585_v60 = vpop.permute.xlu1 %584 }
 0x174   : > { %v564_v55 = vrot.slane %v556_v49, 1  ;;  %v565_v56 = vrot.slane %v557_v50, 1  ;;  %v578_v57 = vsel %vm300_vm3, %v556_v49, -inf  ;;  %v579_v59 = vsel %vm301_vm4, %v557_v50, -inf }
 0x175   : > { %v574_v61 = vsel %vm300_vm3, %v560_v51, -inf  ;;  %v575_v62 = vsel %vm301_vm4, %v561_v52, -inf  ;;  %v576_v63 = vsel %vm300_vm3, %v562_v53, -inf  ;;  %v577_v1 = vsel %vm301_vm4, %v563_v54, -inf  ;;  %v647_v52 = vpop.permute.xlu0 %646 }
 0x176   : > { %v580_v2 = vsel %vm300_vm3, %v564_v55, -inf  ;;  %v581_v4 = vsel %vm301_vm4, %v565_v56, -inf  ;;  %v687_v5 = vcombine.low %v574_v61, %v575_v62  ;;  %v688_v8 = vcombine.low %v576_v63, %v577_v1 }
 0x177   : > { %v716_v10 = vrot.slane %v2586_v39, 3  ;;  %v689_v11 = vcombine.low %v578_v57, %v579_v59  ;;  %v587_v12 = vsel %vm586_vm14, %v583_v9, %v585_v60  ;;  %v588_v13 = vsel %vm586_vm14, %v585_v60, %v583_v9  ;;  %v649_v36 = vpop.permute.xlu1 %648 }
 0x178   : > { %v691_v14 = vrot.slane %v687_v5, 2  ;;  %v692_v15 = vrot.slane %v688_v8, 1  ;;  %v591_v16 = vrot.slane %v588_v13, 5  ;;  %v592_v17 = vrot.slane %v587_v12, 5 }
 0x179   : > { %v690_v42 = vcombine.low %v580_v2, %v581_v4  ;;  %v593_v58 = vrot.slane %v588_v13, 6  ;;  %v594_v18 = vrot.slane %v587_v12, 6  ;;  %v595_v0 = vrot.slane %v588_v13, 7 }
 0x17a   : > { %v693_v20 = vsel %vm454_vm2, %v692_v15, %v691_v14  ;;  %v596_v21 = vrot.slane %v587_v12, 7  ;;  %v605_v22 = vsel %vm300_vm3, %v591_v16, -inf  ;;  %v606_v23 = vsel %vm301_vm4, %v592_v17, -inf }
 0x17b   : > { %v694_v24 = vsel %vm456_vm5, %v692_v15, %v693_v20  ;;  %v607_v25 = vsel %vm300_vm3, %v593_v58, -inf  ;;  %v608_v26 = vsel %vm301_vm4, %v594_v18, -inf  ;;  %v609_v27 = vsel %vm300_vm3, %v595_v0, -inf }
 0x17c   : > { %v695_v28 = vsel %vm459_vm6, %v689_v11, %v694_v24  ;;  %v610_v29 = vsel %vm301_vm4, %v596_v21, -inf  ;;  %v611_v30 = vsel %vm300_vm3, %v588_v13, -inf  ;;  %v612_v31 = vsel %vm301_vm4, %v587_v12, -inf }
 0x17d   : > { %v717_v32 = vrot.slane %v2590_v40, 3  ;;  %v726_v33 = vmax.f32 %v605_v22, %v710_v43  ;;  %v727_v34 = vmax.f32 %v606_v23, %v711_v44  ;;  %v728_v35 = vmax.f32 %v607_v25, %v712_v45 }
 0x17e   : > { %v729_v37 = vmax.f32 %v608_v26, %v713_v46  ;;  %v730_v38 = vmax.f32 %v609_v27, %v714_v47  ;;  %v731_v39 = vmax.f32 %v610_v29, %v715_v48  ;;  %v696_v41 = vsel %vm461_vm7, %v689_v11, %v695_v28 }
 0x17f   : > { %v732_v49 = vmax.f32 %v611_v30, %v716_v10  ;;  %v733_v50 = vmax.f32 %v612_v31, %v717_v32  ;;  %v742_v51 = vcombine.low %v726_v33, %v727_v34  ;;  %v697_v53 = vrot.slane %v690_v42, 7 }
 0x180   : > { %v743_v54 = vcombine.low %v728_v35, %v729_v37  ;;  %v744_v55 = vcombine.low %v730_v38, %v731_v39  ;;  %v651_v56 = vsel %vm650_vm15, %v647_v52, %v649_v36  ;;  %v652_v43 = vsel %vm650_vm15, %v649_v36, %v647_v52 }
 0x181   : > { %v746_v40 = vrot.slane %v742_v51, 3  ;;  %v656_v44 = vrot.slane %v651_v56, 1  ;;  %v698_v45 = vsel %vm464_vm8, %v697_v53, %v696_v41  ;;  %v655_v47 = vrot.slane %v652_v43, 1 }
 0x182   : > { %v747_v46 = vrot.slane %v743_v54, 2  ;;  %v657_v48 = vrot.slane %v652_v43, 2  ;;  %v745_v57 = vcombine.low %v732_v49, %v733_v50  ;;  %v658_v59 = vrot.slane %v651_v56, 2 }
 0x183   : > { %v659_v60 = vrot.slane %v652_v43, 3  ;;  %v660_v61 = vrot.slane %v651_v56, 3  ;;  %v750_v63 = vrot.slane %v744_v55, 1  ;;  %v671_v1 = vsel %vm300_vm3, %v655_v47, -inf }
 0x184   : > { %v748_v62 = vsel %vm454_vm2, %v747_v46, %v746_v40  ;;  %v672_v2 = vsel %vm301_vm4, %v656_v44, -inf  ;;  %v673_v5 = vsel %vm300_vm3, %v657_v48, -inf  ;;  %v674_v8 = vsel %vm301_vm4, %v658_v59, -inf }
 0x185   : > { %v749_v4 = vsel %vm456_vm5, %v747_v46, %v748_v62  ;;  %v675_v9 = vsel %vm300_vm3, %v659_v60, -inf  ;;  %v661_v11 = vrot.slane %v652_v43, 4  ;;  %v662_v12 = vrot.slane %v651_v56, 4 }
 0x186   : > { %v751_v10 = vsel %vm459_vm6, %v750_v63, %v749_v4  ;;  %v676_v13 = vsel %vm301_vm4, %v660_v61, -inf  ;;  %v765_v15 = vcombine.high %v671_v1, %v672_v2  ;;  %v766_v16 = vcombine.high %v673_v5, %v674_v8 }
 0x187   : > { %v752_v14 = vsel %vm461_vm7, %v750_v63, %v751_v10  ;;  %v767_v17 = vcombine.high %v675_v9, %v676_v13  ;;  %v699_v42 = vsel %vm466_vm11, %v697_v53, %v698_v45  ;;  %v677_v21 = vsel %vm300_vm3, %v661_v11, -inf }
 0x188   : > { %v753_v58 = vsel %vm464_vm8, %v745_v57, %v752_v14  ;;  %v769_v18 = vrot.slane %v765_v15, 3  ;;  %v770_v0 = vrot.slane %v766_v16, 2  ;;  %v678_v22 = vsel %vm301_vm4, %v662_v12, -inf }
 0x189   : > { %v754_v20 = vsel %vm466_vm11, %v745_v57, %v753_v58  ;;  %v701_v23 = vmax.f32 %v2538_v19, %v699_v42  ;;  %v773_v25 = vrot.slane %v767_v17, 1  ;;  %v768_v28 = vcombine.high %v677_v21, %v678_v22 }
 0x18a   : > { %v771_v24 = vsel %vm454_vm2, %v770_v0, %v769_v18 }
 0x18b   : > { %v772_v26 = vsel %vm456_vm5, %v770_v0, %v771_v24  ;;  %v756_v27 = vmax.f32 %v701_v23, %v754_v20 }
 0x18c   : > { %v774_v29 = vsel %vm459_vm6, %v773_v25, %v772_v26 }
 0x18d   : > { %v775_v30 = vsel %vm461_vm7, %v773_v25, %v774_v29 }
 0x18e   : > { %v776_v31 = vsel %vm464_vm8, %v768_v28, %v775_v30 }
 0x18f   : > { %v777_v32 = vsel %vm466_vm11, %v768_v28, %v776_v31 }
 0x190   : > { %v2681_v33 = vmax.f32 %v756_v27, %v777_v32 }
 0x192   : > { %784 = vst [vmem:[#allocation2 + $0x8] sm:$0xf0] %v2681_v33  ;;  %847 = vrot.lane.b32.xlu0 %v2681_v33, %s2203_s27  ;;  %v785_v19 = vcombine.high %v2681_v33, %v2681_v33  ;;  %v781_v34 = vcombine.low %v2681_v33, %v2681_v33 }
 0x194   : > { %849 = vrot.lane.b32.xlu1 %v785_v19, %s2203_s27  ;;  %783 = vst [vmem:[#allocation2] sm:$0xf0] %v781_v34 }
 0x196   : > { %787 = vrot.lane.b32.xlu0 %v2681_v33, %s2202_s23 }
 0x198   : > { %789 = vrot.lane.b32.xlu1 %v785_v19, %s2202_s23 }
 0x19a   : > { %817 = vrot.lane.b32.xlu0 %v2681_v33, %s2204_s25 }
 0x19c   : > { %819 = vrot.lane.b32.xlu1 %v785_v19, %s2204_s25 }
 0x19e   : > { %879 = vrot.lane.b32.xlu0 %v2681_v33, %s2205_s14 }
 0x1a0   : > { %881 = vrot.lane.b32.xlu1 %v785_v19, %s2205_s14 }
 0x204   : > { %v848_v35 = vpop.permute.xlu0 %847 }
 0x206   : > { %v850_v36 = vpop.permute.xlu1 %849 }
 0x207   : > { %v851_v37 = vsel %vm379_vm1, %v848_v35, %v850_v36  ;;  %v852_v38 = vsel %vm379_vm1, %v850_v36, %v848_v35 }
 0x208   : > { %v855_v39 = vrot.slane %v851_v37, 4  ;;  %v856_v41 = vrot.slane %v852_v38, 4  ;;  %v857_v49 = vrot.slane %v851_v37, 5  ;;  %v858_v50 = vrot.slane %v852_v38, 5  ;;  %v788_v59 = vpop.permute.xlu0 %787 }
 0x209   : > { %v859_v51 = vrot.slane %v851_v37, 6  ;;  %v860_v52 = vrot.slane %v852_v38, 6  ;;  %v861_v53 = vrot.slane %v851_v37, 7  ;;  %v862_v54 = vrot.slane %v852_v38, 7 }
 0x20a   : > { %v2706_v55 = vsel %vm300_vm3, %v855_v39, -inf  ;;  %v2710_v56 = vsel %vm301_vm4, %v856_v41, -inf  ;;  %v2714_v40 = vsel %vm300_vm3, %v857_v49, -inf  ;;  %v2718_v43 = vsel %vm301_vm4, %v858_v50, -inf  ;;  %v790_v44 = vpop.permute.xlu1 %789 }
 0x20b   : > { %v2722_v45 = vsel %vm300_vm3, %v859_v51, -inf  ;;  %v2726_v46 = vsel %vm301_vm4, %v860_v52, -inf  ;;  %v2730_v47 = vsel %vm300_vm3, %v861_v53, -inf  ;;  %v2734_v48 = vsel %vm301_vm4, %v862_v54, -inf }
 0x20c   : > { %v942_v57 = vrot.slane %v2706_v55, 3  ;;  %v943_v60 = vrot.slane %v2710_v56, 3  ;;  %v944_v61 = vrot.slane %v2714_v40, 3  ;;  %v945_v62 = vrot.slane %v2718_v43, 3  ;;  %v818_v23 = vpop.permute.xlu0 %817 }
 0x20d   : > { %v946_v63 = vrot.slane %v2722_v45, 3  ;;  %v947_v1 = vrot.slane %v2726_v46, 3  ;;  %v948_v2 = vrot.slane %v2730_v47, 3  ;;  %v791_v4 = vsel %vm313_vm0, %v788_v59, %v790_v44 }
 0x20e   : > { %v792_v5 = vsel %vm313_vm0, %v790_v44, %v788_v59  ;;  %v795_v8 = vrot.slane %v791_v4, 1  ;;  %v797_v10 = vrot.slane %v791_v4, 2  ;;  %v799_v12 = vrot.slane %v791_v4, 3  ;;  %v820_v16 = vpop.permute.xlu1 %819 }
 0x20f   : > { %v796_v9 = vrot.slane %v792_v5, 1  ;;  %v798_v11 = vrot.slane %v792_v5, 2  ;;  %v800_v13 = vrot.slane %v792_v5, 3  ;;  %v809_v14 = vsel %vm300_vm3, %v791_v4, -inf }
 0x210   : > { %v810_v15 = vsel %vm301_vm4, %v792_v5, -inf  ;;  %v811_v17 = vsel %vm300_vm3, %v795_v8, -inf  ;;  %v813_v58 = vsel %vm300_vm3, %v797_v10, -inf  ;;  %v949_v0 = vrot.slane %v2734_v48, 3 }
 0x211   : > { %v812_v42 = vsel %vm301_vm4, %v796_v9, -inf  ;;  %v814_v18 = vsel %vm301_vm4, %v798_v11, -inf  ;;  %v815_v20 = vsel %vm300_vm3, %v799_v12, -inf  ;;  %v816_v21 = vsel %vm301_vm4, %v800_v13, -inf  ;;  %v880_v9 = vpop.permute.xlu0 %879 }
 0x212   : > { %v920_v22 = vcombine.low %v811_v17, %v812_v42  ;;  %v919_v24 = vcombine.low %v809_v14, %v810_v15  ;;  %v921_v25 = vcombine.low %v813_v58, %v814_v18  ;;  %v821_v26 = vsel %vm348_vm9, %v818_v23, %v820_v16  ;;  %v882_v45 = vpop.permute.xlu1 %881 }
 0x213   : > { %v822_v27 = vsel %vm348_vm9, %v820_v16, %v818_v23  ;;  %v826_v30 = vrot.slane %v821_v26, 7  ;;  %v922_v32 = vcombine.low %v815_v20, %v816_v21  ;;  %v828_v34 = vrot.slane %v821_v26, 1 }
 0x214   : > { %v923_v28 = vrot.slane %v920_v22, 7  ;;  %v825_v29 = vrot.slane %v822_v27, 7  ;;  %v827_v31 = vrot.slane %v822_v27, 1  ;;  %v926_v19 = vrot.slane %v921_v25, 6 }
 0x215   : > { %v829_v35 = vrot.slane %v822_v27, 2  ;;  %v830_v37 = vrot.slane %v821_v26, 2  ;;  %v840_v39 = vsel %vm301_vm4, %v826_v30, -inf  ;;  %v841_v49 = vsel %vm300_vm3, %v822_v27, -inf }
 0x216   : > { %v924_v36 = vsel %vm454_vm2, %v923_v28, %v919_v24  ;;  %v839_v38 = vsel %vm300_vm3, %v825_v29, -inf  ;;  %v842_v50 = vsel %vm301_vm4, %v821_v26, -inf  ;;  %v843_v51 = vsel %vm300_vm3, %v827_v31, -inf }
 0x217   : > { %v925_v41 = vsel %vm456_vm5, %v923_v28, %v924_v36  ;;  %v844_v53 = vsel %vm301_vm4, %v828_v34, -inf  ;;  %v845_v54 = vsel %vm300_vm3, %v829_v35, -inf  ;;  %v846_v55 = vsel %vm301_vm4, %v830_v37, -inf }
 0x218   : > { %v927_v52 = vsel %vm459_vm6, %v926_v19, %v925_v41  ;;  %v958_v40 = vmax.f32 %v839_v38, %v942_v57  ;;  %v959_v43 = vmax.f32 %v840_v39, %v943_v60  ;;  %v960_v44 = vmax.f32 %v841_v49, %v944_v61 }
 0x219   : > { %v928_v56 = vsel %vm461_vm7, %v926_v19, %v927_v52  ;;  %v929_v46 = vrot.slane %v922_v32, 5  ;;  %v961_v47 = vmax.f32 %v842_v50, %v945_v62  ;;  %v962_v48 = vmax.f32 %v843_v51, %v946_v63 }
 0x21a   : > { %v963_v59 = vmax.f32 %v844_v53, %v947_v1  ;;  %v964_v4 = vmax.f32 %v845_v54, %v948_v2  ;;  %v965_v5 = vmax.f32 %v846_v55, %v949_v0  ;;  %v974_v8 = vcombine.low %v958_v40, %v959_v43 }
 0x21b   : > { %v930_v10 = vsel %vm464_vm8, %v929_v46, %v928_v56  ;;  %v975_v11 = vcombine.low %v960_v44, %v961_v47  ;;  %v883_v13 = vsel %vm412_vm10, %v880_v9, %v882_v45  ;;  %v884_v60 = vsel %vm412_vm10, %v882_v45, %v880_v9 }
 0x21c   : > { %v976_v12 = vcombine.low %v962_v48, %v963_v59  ;;  %v977_v14 = vcombine.low %v964_v4, %v965_v5  ;;  %v978_v57 = vrot.slane %v974_v8, 1  ;;  %v888_v61 = vrot.slane %v883_v13, 3 }
 0x21d   : > { %v887_v63 = vrot.slane %v884_v60, 3  ;;  %v889_v1 = vrot.slane %v884_v60, 4  ;;  %v890_v2 = vrot.slane %v883_v13, 4  ;;  %v891_v17 = vrot.slane %v884_v60, 5 }
 0x21e   : > { %v981_v62 = vrot.slane %v976_v12, 7  ;;  %v979_v15 = vsel %vm454_vm2, %v975_v11, %v978_v57  ;;  %v984_v16 = vrot.slane %v977_v14, 6  ;;  %v892_v42 = vrot.slane %v883_v13, 5 }
 0x21f   : > { %v980_v58 = vsel %vm456_vm5, %v975_v11, %v979_v15  ;;  %v893_v18 = vrot.slane %v884_v60, 6  ;;  %v894_v0 = vrot.slane %v883_v13, 6  ;;  %v903_v20 = vsel %vm300_vm3, %v887_v63, -inf }
 0x220   : > { %v982_v21 = vsel %vm459_vm6, %v981_v62, %v980_v58  ;;  %v904_v22 = vsel %vm301_vm4, %v888_v61, -inf  ;;  %v905_v23 = vsel %vm300_vm3, %v889_v1, -inf  ;;  %v906_v24 = vsel %vm301_vm4, %v890_v2, -inf }
 0x221   : > { %v983_v25 = vsel %vm461_vm7, %v981_v62, %v982_v21  ;;  %v907_v26 = vsel %vm300_vm3, %v891_v17, -inf  ;;  %v908_v27 = vsel %vm301_vm4, %v892_v42, -inf  ;;  %v909_v28 = vsel %vm300_vm3, %v893_v18, -inf }
 0x222   : > { %v985_v29 = vsel %vm464_vm8, %v984_v16, %v983_v25  ;;  %v910_v30 = vsel %vm301_vm4, %v894_v0, -inf  ;;  %v997_v31 = vcombine.high %v903_v20, %v904_v22  ;;  %v931_v32 = vsel %vm466_vm11, %v929_v46, %v930_v10 }
 0x223   : > { %v999_v19 = vcombine.high %v907_v26, %v908_v27  ;;  %v998_v34 = vcombine.high %v905_v23, %v906_v24  ;;  %v1000_v35 = vcombine.high %v909_v28, %v910_v30  ;;  %v986_v37 = vsel %vm466_vm11, %v984_v16, %v985_v29 }
 0x224   : > { %v1001_v36 = vrot.slane %v997_v31, 1  ;;  %v933_v38 = vmax.f32 %v2681_v33, %v931_v32 }
 0x225   : > { %v1004_v41 = vrot.slane %v999_v19, 7  ;;  %v1007_v52 = vrot.slane %v1000_v35, 6 }
 0x226   : > { %v1002_v39 = vsel %vm454_vm2, %v998_v34, %v1001_v36  ;;  %v988_v50 = vmax.f32 %v933_v38, %v986_v37 }
 0x227   : > { %v1003_v49 = vsel %vm456_vm5, %v998_v34, %v1002_v39 }
 0x228   : > { %v1005_v51 = vsel %vm459_vm6, %v1004_v41, %v1003_v49 }
 0x229   : > { %v1006_v53 = vsel %vm461_vm7, %v1004_v41, %v1005_v51 }
 0x22a   : > { %v1008_v54 = vsel %vm464_vm8, %v1007_v52, %v1006_v53 }
 0x22b   : > { %v1009_v55 = vsel %vm466_vm11, %v1007_v52, %v1008_v54 }
 0x22c   : > { %v2823_v56 = vmax.f32 %v988_v50, %v1009_v55 }
 0x22e   : > { %1075 = vrot.lane.b32.xlu0 %v2823_v56, %s2206_s6  ;;  %v1013_v33 = vcombine.high %v2823_v56, %v2823_v56 }
 0x230   : > { %1077 = vrot.lane.b32.xlu1 %v1013_v33, %s2206_s6 }
 0x232   : > { %1015 = vrot.lane.b32.xlu0 %v2823_v56, %s2207_s29 }
 0x234   : > { %1017 = vrot.lane.b32.xlu1 %v1013_v33, %s2207_s29 }
 0x236   : > { %1045 = vrot.lane.b32.xlu0 %v2823_v56, %s2208_s7 }
 0x238   : > { %1047 = vrot.lane.b32.xlu1 %v1013_v33, %s2208_s7 }
 0x23a   : > { %1107 = vrot.lane.b32.xlu0 %v2823_v56, %s2209_s11 }
 0x23c   : > { %1109 = vrot.lane.b32.xlu1 %v1013_v33, %s2209_s11 }
 0x2a0   : > { %v1076_v40 = vpop.permute.xlu0 %1075 }
 0x2a2   : > { %v1078_v43 = vpop.permute.xlu1 %1077 }
 0x2a3   : > { %v1079_v44 = vsel %vm617_vm12, %v1076_v40, %v1078_v43  ;;  %v1080_v45 = vsel %vm617_vm12, %v1078_v43, %v1076_v40 }
 0x2a4   : > { %v1083_v46 = vrot.slane %v1079_v44, 2  ;;  %v1084_v47 = vrot.slane %v1080_v45, 2  ;;  %v1085_v48 = vrot.slane %v1079_v44, 3  ;;  %v1086_v59 = vrot.slane %v1080_v45, 3  ;;  %v1016_v63 = vpop.permute.xlu0 %1015 }
 0x2a5   : > { %v1087_v4 = vrot.slane %v1079_v44, 4  ;;  %v1088_v5 = vrot.slane %v1080_v45, 4  ;;  %v1089_v8 = vrot.slane %v1079_v44, 5  ;;  %v1090_v9 = vrot.slane %v1080_v45, 5 }
 0x2a6   : > { %v1099_v10 = vsel %vm300_vm3, %v1083_v46, -inf  ;;  %v1100_v11 = vsel %vm301_vm4, %v1084_v47, -inf  ;;  %v1101_v12 = vsel %vm300_vm3, %v1085_v48, -inf  ;;  %v2851_v13 = vsel %vm301_vm4, %v1086_v59, -inf  ;;  %v1018_v14 = vpop.permute.xlu1 %1017 }
 0x2a7   : > { %v1103_v57 = vsel %vm300_vm3, %v1087_v4, -inf  ;;  %v1104_v60 = vsel %vm301_vm4, %v1088_v5, -inf  ;;  %v2859_v61 = vsel %vm300_vm3, %v1089_v8, -inf  ;;  %v2863_v62 = vsel %vm301_vm4, %v1090_v9, -inf }
 0x2a8   : > { %v1170_v1 = vrot.slane %v1099_v10, 3  ;;  %v1171_v2 = vrot.slane %v1100_v11, 3  ;;  %v1172_v15 = vrot.slane %v1101_v12, 3  ;;  %v1173_v16 = vrot.slane %v2851_v13, 3  ;;  %v1046_v36 = vpop.permute.xlu0 %1045 }
 0x2a9   : > { %v1174_v17 = vrot.slane %v1103_v57, 3  ;;  %v1175_v42 = vrot.slane %v1104_v60, 3  ;;  %v1019_v58 = vsel %vm555_vm13, %v1016_v63, %v1018_v14  ;;  %v1020_v18 = vsel %vm555_vm13, %v1018_v14, %v1016_v63 }
 0x2aa   : > { %v1023_v0 = vrot.slane %v1019_v58, 6  ;;  %v1024_v20 = vrot.slane %v1020_v18, 6  ;;  %v1025_v21 = vrot.slane %v1019_v58, 7  ;;  %v1026_v22 = vrot.slane %v1020_v18, 7  ;;  %v1048_v27 = vpop.permute.xlu1 %1047 }
 0x2ab   : > { %v1027_v23 = vrot.slane %v1019_v58, 1  ;;  %v1028_v24 = vrot.slane %v1020_v18, 1  ;;  %v1041_v25 = vsel %vm300_vm3, %v1019_v58, -inf  ;;  %v1042_v26 = vsel %vm301_vm4, %v1020_v18, -inf }
 0x2ac   : > { %v1037_v28 = vsel %vm300_vm3, %v1023_v0, -inf  ;;  %v1038_v29 = vsel %vm301_vm4, %v1024_v20, -inf  ;;  %v1039_v30 = vsel %vm300_vm3, %v1025_v21, -inf  ;;  %v1040_v31 = vsel %vm301_vm4, %v1026_v22, -inf  ;;  %v1108_v20 = vpop.permute.xlu0 %1107 }
 0x2ad   : > { %v1043_v32 = vsel %vm300_vm3, %v1027_v23, -inf  ;;  %v1044_v19 = vsel %vm301_vm4, %v1028_v24, -inf  ;;  %v1147_v34 = vcombine.low %v1037_v28, %v1038_v29  ;;  %v1148_v35 = vcombine.low %v1039_v30, %v1040_v31 }
 0x2ae   : > { %v1176_v37 = vrot.slane %v2859_v61, 3  ;;  %v1149_v38 = vcombine.low %v1041_v25, %v1042_v26  ;;  %v1049_v39 = vsel %vm586_vm14, %v1046_v36, %v1048_v27  ;;  %v1050_v41 = vsel %vm586_vm14, %v1048_v27, %v1046_v36  ;;  %v1110_v14 = vpop.permute.xlu1 %1109 }
 0x2af   : > { %v1151_v49 = vrot.slane %v1147_v34, 2  ;;  %v1152_v50 = vrot.slane %v1148_v35, 1  ;;  %v1053_v51 = vrot.slane %v1050_v41, 5  ;;  %v1054_v52 = vrot.slane %v1049_v39, 5 }
 0x2b0   : > { %v1150_v53 = vcombine.low %v1043_v32, %v1044_v19  ;;  %v1055_v54 = vrot.slane %v1050_v41, 6  ;;  %v1056_v55 = vrot.slane %v1049_v39, 6  ;;  %v1057_v33 = vrot.slane %v1050_v41, 7 }
 0x2b1   : > { %v1153_v40 = vsel %vm454_vm2, %v1152_v50, %v1151_v49  ;;  %v1058_v43 = vrot.slane %v1049_v39, 7  ;;  %v1067_v44 = vsel %vm300_vm3, %v1053_v51, -inf  ;;  %v1068_v45 = vsel %vm301_vm4, %v1054_v52, -inf }
 0x2b2   : > { %v1154_v46 = vsel %vm456_vm5, %v1152_v50, %v1153_v40  ;;  %v1069_v47 = vsel %vm300_vm3, %v1055_v54, -inf  ;;  %v1070_v48 = vsel %vm301_vm4, %v1056_v55, -inf  ;;  %v1071_v59 = vsel %vm300_vm3, %v1057_v33, -inf }
 0x2b3   : > { %v1155_v4 = vsel %vm459_vm6, %v1149_v38, %v1154_v46  ;;  %v1072_v5 = vsel %vm301_vm4, %v1058_v43, -inf  ;;  %v1073_v8 = vsel %vm300_vm3, %v1050_v41, -inf  ;;  %v1074_v9 = vsel %vm301_vm4, %v1049_v39, -inf }
 0x2b4   : > { %v1177_v10 = vrot.slane %v2863_v62, 3  ;;  %v1186_v11 = vmax.f32 %v1067_v44, %v1170_v1  ;;  %v1187_v12 = vmax.f32 %v1068_v45, %v1171_v2  ;;  %v1188_v13 = vmax.f32 %v1069_v47, %v1172_v15 }
 0x2b5   : > { %v1189_v57 = vmax.f32 %v1070_v48, %v1173_v16  ;;  %v1190_v60 = vmax.f32 %v1071_v59, %v1174_v17  ;;  %v1191_v61 = vmax.f32 %v1072_v5, %v1175_v42  ;;  %v1156_v63 = vsel %vm461_vm7, %v1149_v38, %v1155_v4 }
 0x2b6   : > { %v1192_v58 = vmax.f32 %v1073_v8, %v1176_v37  ;;  %v1193_v18 = vmax.f32 %v1074_v9, %v1177_v10  ;;  %v1202_v0 = vcombine.low %v1186_v11, %v1187_v12  ;;  %v1157_v21 = vrot.slane %v1150_v53, 7 }
 0x2b7   : > { %v1203_v22 = vcombine.low %v1188_v13, %v1189_v57  ;;  %v1204_v23 = vcombine.low %v1190_v60, %v1191_v61  ;;  %v1111_v24 = vsel %vm650_vm15, %v1108_v20, %v1110_v14  ;;  %v1112_v1 = vsel %vm650_vm15, %v1110_v14, %v1108_v20 }
 0x2b8   : > { %v1206_v62 = vrot.slane %v1202_v0, 3  ;;  %v1116_v2 = vrot.slane %v1111_v24, 1  ;;  %v1158_v15 = vsel %vm464_vm8, %v1157_v21, %v1156_v63  ;;  %v1115_v17 = vrot.slane %v1112_v1, 1 }
 0x2b9   : > { %v1207_v16 = vrot.slane %v1203_v22, 2  ;;  %v1117_v42 = vrot.slane %v1112_v1, 2  ;;  %v1205_v25 = vcombine.low %v1192_v58, %v1193_v18  ;;  %v1118_v26 = vrot.slane %v1111_v24, 2 }
 0x2ba   : > { %v1119_v27 = vrot.slane %v1112_v1, 3  ;;  %v1120_v28 = vrot.slane %v1111_v24, 3  ;;  %v1210_v30 = vrot.slane %v1204_v23, 1  ;;  %v1131_v31 = vsel %vm300_vm3, %v1115_v17, -inf }
 0x2bb   : > { %v1208_v29 = vsel %vm454_vm2, %v1207_v16, %v1206_v62  ;;  %v1132_v32 = vsel %vm301_vm4, %v1116_v2, -inf  ;;  %v1133_v34 = vsel %vm300_vm3, %v1117_v42, -inf  ;;  %v1134_v35 = vsel %vm301_vm4, %v1118_v26, -inf }
 0x2bc   : > { %v1209_v19 = vsel %vm456_vm5, %v1207_v16, %v1208_v29  ;;  %v1135_v36 = vsel %vm300_vm3, %v1119_v27, -inf  ;;  %v1121_v38 = vrot.slane %v1112_v1, 4  ;;  %v1122_v39 = vrot.slane %v1111_v24, 4 }
 0x2bd   : > { %v1211_v37 = vsel %vm459_vm6, %v1210_v30, %v1209_v19  ;;  %v1136_v41 = vsel %vm301_vm4, %v1120_v28, -inf  ;;  %v1225_v50 = vcombine.high %v1131_v31, %v1132_v32  ;;  %v1226_v51 = vcombine.high %v1133_v34, %v1134_v35 }
 0x2be   : > { %v1212_v49 = vsel %vm461_vm7, %v1210_v30, %v1211_v37  ;;  %v1227_v52 = vcombine.high %v1135_v36, %v1136_v41  ;;  %v1159_v53 = vsel %vm466_vm11, %v1157_v21, %v1158_v15  ;;  %v1137_v43 = vsel %vm300_vm3, %v1121_v38, -inf }
 0x2bf   : > { %v1213_v54 = vsel %vm464_vm8, %v1205_v25, %v1212_v49  ;;  %v1229_v55 = vrot.slane %v1225_v50, 3  ;;  %v1230_v33 = vrot.slane %v1226_v51, 2  ;;  %v1138_v44 = vsel %vm301_vm4, %v1122_v39, -inf }
 0x2c0   : > { %v1214_v40 = vsel %vm466_vm11, %v1205_v25, %v1213_v54  ;;  %v1161_v45 = vmax.f32 %v2823_v56, %v1159_v53  ;;  %v1233_v47 = vrot.slane %v1227_v52, 1  ;;  %v1228_v4 = vcombine.high %v1137_v43, %v1138_v44 }
 0x2c1   : > { %v1231_v46 = vsel %vm454_vm2, %v1230_v33, %v1229_v55 }
 0x2c2   : > { %v1232_v48 = vsel %vm456_vm5, %v1230_v33, %v1231_v46  ;;  %v1216_v59 = vmax.f32 %v1161_v45, %v1214_v40 }
 0x2c3   : > { %v1234_v5 = vsel %vm459_vm6, %v1233_v47, %v1232_v48 }
 0x2c4   : > { %v1235_v8 = vsel %vm461_vm7, %v1233_v47, %v1234_v5 }
 0x2c5   : > { %v1236_v9 = vsel %vm464_vm8, %v1228_v4, %v1235_v8 }
 0x2c6   : > { %v1237_v10 = vsel %vm466_vm11, %v1228_v4, %v1236_v9 }
 0x2c7   : > { %v2947_v11 = vmax.f32 %v1216_v59, %v1237_v10 }
 0x2c9   : > { %1243 = vst [vmem:[#allocation2 + $0x10] sm:$0xf] %v2947_v11  ;;  %1305 = vrot.lane.b32.xlu0 %v2947_v11, %s2203_s27  ;;  %v1241_v56 = vcombine.high %v2947_v11, %v2947_v11 }
 0x2cb   : > { %1307 = vrot.lane.b32.xlu1 %v1241_v56, %s2203_s27  ;;  %1244 = vst [vmem:[#allocation2 + $0x18] sm:$0xf] %v1241_v56 }
 0x2cd   : > { %1245 = vrot.lane.b32.xlu0 %v2947_v11, %s2202_s23 }
 0x2cf   : > { %1247 = vrot.lane.b32.xlu1 %v1241_v56, %s2202_s23  ;;  %s1811_s23 = sshll.u32 %s285_s13, 4  ;;  %s3225_s23 = int_to_ptr.vmem [resolvable:$true] %s1811_s23 }
 0x2d0   : > { %p2119_p9 = scmp.lt.s32.totalorder %s3225_s23, %s2117_s21 }
 0x2d1   : > { %1275 = vrot.lane.b32.xlu0 %v2947_v11, %s2204_s25 }
 0x2d3   : > { %1277 = vrot.lane.b32.xlu1 %v1241_v56, %s2204_s25 }
 0x2d5   : > { %1337 = vrot.lane.b32.xlu0 %v2947_v11, %s2205_s14 }
 0x2d7   : > { %1339 = vrot.lane.b32.xlu1 %v1241_v56, %s2205_s14  ;;  %s3223_s14 = scalar_lea.hbm %s3276_s4, %s1964_s30 }
 0x33b   : > { %v1306_v12 = vpop.permute.xlu0 %1305 }
 0x33d   : > { %v1308_v13 = vpop.permute.xlu1 %1307 }
 0x33e   : > { %v1309_v14 = vsel %vm379_vm1, %v1306_v12, %v1308_v13  ;;  %v1310_v57 = vsel %vm379_vm1, %v1308_v13, %v1306_v12 }
 0x33f   : > { %v1313_v60 = vrot.slane %v1309_v14, 4  ;;  %v1314_v61 = vrot.slane %v1310_v57, 4  ;;  %v1315_v63 = vrot.slane %v1309_v14, 5  ;;  %v1316_v58 = vrot.slane %v1310_v57, 5  ;;  %v1246_v25 = vpop.permute.xlu0 %1245 }
 0x340   : > { %v1317_v18 = vrot.slane %v1309_v14, 6  ;;  %v1318_v0 = vrot.slane %v1310_v57, 6  ;;  %v1319_v20 = vrot.slane %v1309_v14, 7  ;;  %v1320_v21 = vrot.slane %v1310_v57, 7 }
 0x341   : > { %v2970_v22 = vsel %vm300_vm3, %v1313_v60, -inf  ;;  %v2974_v23 = vsel %vm301_vm4, %v1314_v61, -inf  ;;  %v2978_v24 = vsel %vm300_vm3, %v1315_v63, -inf  ;;  %v2982_v62 = vsel %vm301_vm4, %v1316_v58, -inf  ;;  %v1248_v1 = vpop.permute.xlu1 %1247 }
 0x342   : > { %v2986_v2 = vsel %vm300_vm3, %v1317_v18, -inf  ;;  %v2990_v15 = vsel %vm301_vm4, %v1318_v0, -inf  ;;  %v2994_v16 = vsel %vm300_vm3, %v1319_v20, -inf  ;;  %v2998_v17 = vsel %vm301_vm4, %v1320_v21, -inf }
 0x343   : > { %v1400_v42 = vrot.slane %v2970_v22, 3  ;;  %v1401_v26 = vrot.slane %v2974_v23, 3  ;;  %v1402_v27 = vrot.slane %v2978_v24, 3  ;;  %v1403_v28 = vrot.slane %v2982_v62, 3  ;;  %v1276_v44 = vpop.permute.xlu0 %1275 }
 0x344   : > { %v1404_v29 = vrot.slane %v2986_v2, 3  ;;  %v1405_v30 = vrot.slane %v2990_v15, 3  ;;  %v1406_v31 = vrot.slane %v2994_v16, 3  ;;  %v1249_v32 = vsel %vm313_vm0, %v1246_v25, %v1248_v1 }
 0x345   : > { %v1250_v19 = vsel %vm313_vm0, %v1248_v1, %v1246_v25  ;;  %v1253_v34 = vrot.slane %v1249_v32, 1  ;;  %v1255_v36 = vrot.slane %v1249_v32, 2  ;;  %v1257_v38 = vrot.slane %v1249_v32, 3  ;;  %v1278_v50 = vpop.permute.xlu1 %1277 }
 0x346   : > { %v1254_v35 = vrot.slane %v1250_v19, 1  ;;  %v1256_v37 = vrot.slane %v1250_v19, 2  ;;  %v1258_v39 = vrot.slane %v1250_v19, 3  ;;  %v1267_v41 = vsel %vm300_vm3, %v1249_v32, -inf }
 0x347   : > { %v1268_v49 = vsel %vm301_vm4, %v1250_v19, -inf  ;;  %v1269_v51 = vsel %vm300_vm3, %v1253_v34, -inf  ;;  %v1271_v53 = vsel %vm300_vm3, %v1255_v36, -inf  ;;  %v1407_v55 = vrot.slane %v2998_v17, 3 }
 0x348   : > { %v1270_v52 = vsel %vm301_vm4, %v1254_v35, -inf  ;;  %v1272_v54 = vsel %vm301_vm4, %v1256_v37, -inf  ;;  %v1273_v33 = vsel %vm300_vm3, %v1257_v38, -inf  ;;  %v1274_v40 = vsel %vm301_vm4, %v1258_v39, -inf  ;;  %v1338_v35 = vpop.permute.xlu0 %1337 }
 0x349   : > { %v1378_v43 = vcombine.low %v1269_v51, %v1270_v52  ;;  %v1377_v45 = vcombine.low %v1267_v41, %v1268_v49  ;;  %v1379_v46 = vcombine.low %v1271_v53, %v1272_v54  ;;  %v1279_v47 = vsel %vm348_vm9, %v1276_v44, %v1278_v50  ;;  %v1340_v2 = vpop.permute.xlu1 %1339 }
 0x34a   : > { %v1280_v48 = vsel %vm348_vm9, %v1278_v50, %v1276_v44  ;;  %v1284_v5 = vrot.slane %v1279_v47, 7  ;;  %v1380_v9 = vcombine.low %v1273_v33, %v1274_v40  ;;  %v1286_v56 = vrot.slane %v1279_v47, 1 }
 0x34b   : > { %v1381_v59 = vrot.slane %v1378_v43, 7  ;;  %v1283_v4 = vrot.slane %v1280_v48, 7  ;;  %v1285_v8 = vrot.slane %v1280_v48, 1  ;;  %v1384_v10 = vrot.slane %v1379_v46, 6 }
 0x34c   : > { %v1287_v12 = vrot.slane %v1280_v48, 2  ;;  %v1288_v14 = vrot.slane %v1279_v47, 2  ;;  %v1298_v60 = vsel %vm301_vm4, %v1284_v5, -inf  ;;  %v1299_v63 = vsel %vm300_vm3, %v1280_v48, -inf }
 0x34d   : > { %v1382_v13 = vsel %vm454_vm2, %v1381_v59, %v1377_v45  ;;  %v1297_v57 = vsel %vm300_vm3, %v1283_v4, -inf  ;;  %v1300_v58 = vsel %vm301_vm4, %v1279_v47, -inf  ;;  %v1301_v18 = vsel %vm300_vm3, %v1285_v8, -inf }
 0x34e   : > { %v1383_v61 = vsel %vm456_vm5, %v1381_v59, %v1382_v13  ;;  %v1302_v20 = vsel %vm301_vm4, %v1286_v56, -inf  ;;  %v1303_v21 = vsel %vm300_vm3, %v1287_v12, -inf  ;;  %v1304_v22 = vsel %vm301_vm4, %v1288_v14, -inf }
 0x34f   : > { %v1385_v0 = vsel %vm459_vm6, %v1384_v10, %v1383_v61  ;;  %v1416_v24 = vmax.f32 %v1297_v57, %v1400_v42  ;;  %v1417_v62 = vmax.f32 %v1298_v60, %v1401_v26  ;;  %v1418_v1 = vmax.f32 %v1299_v63, %v1402_v27 }
 0x350   : > { %v1386_v23 = vsel %vm461_vm7, %v1384_v10, %v1385_v0  ;;  %v1387_v15 = vrot.slane %v1380_v9, 5  ;;  %v1419_v16 = vmax.f32 %v1300_v58, %v1403_v28  ;;  %v1420_v17 = vmax.f32 %v1301_v18, %v1404_v29 }
 0x351   : > { %v1421_v25 = vmax.f32 %v1302_v20, %v1405_v30  ;;  %v1422_v32 = vmax.f32 %v1303_v21, %v1406_v31  ;;  %v1423_v19 = vmax.f32 %v1304_v22, %v1407_v55  ;;  %v1432_v34 = vcombine.low %v1416_v24, %v1417_v62  ;;  %v1708_v62 = vld [vmem:[%s3275_s3] sm:$0xf] }
 0x352   : > { %v1388_v36 = vsel %vm464_vm8, %v1387_v15, %v1386_v23  ;;  %v1433_v37 = vcombine.low %v1418_v1, %v1419_v16  ;;  %v1341_v39 = vsel %vm412_vm10, %v1338_v35, %v1340_v2  ;;  %v1342_v26 = vsel %vm412_vm10, %v1340_v2, %v1338_v35 }
 0x353   : > { %v1434_v38 = vcombine.low %v1420_v17, %v1421_v25  ;;  %v1435_v41 = vcombine.low %v1422_v32, %v1423_v19  ;;  %v1436_v42 = vrot.slane %v1432_v34, 1  ;;  %v1346_v27 = vrot.slane %v1341_v39, 3 }
 0x354   : > { %v1345_v29 = vrot.slane %v1342_v26, 3  ;;  %v1347_v30 = vrot.slane %v1342_v26, 4  ;;  %v1348_v31 = vrot.slane %v1341_v39, 4  ;;  %v1349_v51 = vrot.slane %v1342_v26, 5 }
 0x355   : > { %v1439_v28 = vrot.slane %v1434_v38, 7  ;;  %v1437_v49 = vsel %vm454_vm2, %v1433_v37, %v1436_v42  ;;  %v1442_v50 = vrot.slane %v1435_v41, 6  ;;  %v1350_v52 = vrot.slane %v1341_v39, 5 }
 0x356   : > { %v1438_v53 = vsel %vm456_vm5, %v1433_v37, %v1437_v49  ;;  %v1351_v54 = vrot.slane %v1342_v26, 6  ;;  %v1352_v55 = vrot.slane %v1341_v39, 6  ;;  %v1361_v33 = vsel %vm300_vm3, %v1345_v29, -inf }
 0x357   : > { %v1440_v40 = vsel %vm459_vm6, %v1439_v28, %v1438_v53  ;;  %v1362_v43 = vsel %vm301_vm4, %v1346_v27, -inf  ;;  %v1363_v44 = vsel %vm300_vm3, %v1347_v30, -inf  ;;  %v1364_v45 = vsel %vm301_vm4, %v1348_v31, -inf }
 0x358   : > { %v1441_v46 = vsel %vm461_vm7, %v1439_v28, %v1440_v40  ;;  %v1365_v47 = vsel %vm300_vm3, %v1349_v51, -inf  ;;  %v1366_v48 = vsel %vm301_vm4, %v1350_v52, -inf  ;;  %v1367_v59 = vsel %vm300_vm3, %v1351_v54, -inf }
 0x359   : > { %v1443_v4 = vsel %vm464_vm8, %v1442_v50, %v1441_v46  ;;  %v1368_v5 = vsel %vm301_vm4, %v1352_v55, -inf  ;;  %v1455_v8 = vcombine.high %v1361_v33, %v1362_v43  ;;  %v1389_v9 = vsel %vm466_vm11, %v1387_v15, %v1388_v36 }
 0x35a   : > { %v1457_v10 = vcombine.high %v1365_v47, %v1366_v48  ;;  %v1456_v56 = vcombine.high %v1363_v44, %v1364_v45  ;;  %v1458_v12 = vcombine.high %v1367_v59, %v1368_v5  ;;  %v1444_v14 = vsel %vm466_vm11, %v1442_v50, %v1443_v4 }
 0x35b   : > { %v1459_v13 = vrot.slane %v1455_v8, 1  ;;  %v1391_v57 = vmax.f32 %v2947_v11, %v1389_v9  ;;  %v2210_v24 = vmov 0.0   ;;  %v2211_v1 = vmov 0  }
 0x35c   : > { %v1462_v61 = vrot.slane %v1457_v10, 7  ;;  %v1465_v0 = vrot.slane %v1458_v12, 6  ;;  %1782 = vmatprep.mubr.f32.mxu0 %v2210_v24  ;;  %2052 = vset.pattern.permute.xlu0 %v2211_v1  ;;  %vm1714_vm0 = vcmask 130048  }
 0x35d   : > { %v1460_v60 = vsel %vm454_vm2, %v1456_v56, %v1459_v13  ;;  %v1446_v58 = vmax.f32 %v1391_v57, %v1444_v14 }
 0x35e   : > { %v1461_v63 = vsel %vm456_vm5, %v1456_v56, %v1460_v60 }
 0x35f   : > { %v1463_v18 = vsel %vm459_vm6, %v1462_v61, %v1461_v63 }
 0x360   : > { %v1464_v20 = vsel %vm461_vm7, %v1462_v61, %v1463_v18 }
 0x361   : > { %v1466_v21 = vsel %vm464_vm8, %v1465_v0, %v1464_v20 }
 0x362   : > { %v1467_v22 = vsel %vm466_vm11, %v1465_v0, %v1466_v21 }
 0x363   : > { %v3087_v23 = vmax.f32 %v1446_v58, %v1467_v22 }
 0x365   : > { %1533 = vrot.lane.b32.xlu0 %v3087_v23, %s2206_s6  ;;  %v1471_v11 = vcombine.high %v3087_v23, %v3087_v23 }
 0x367   : > { %1535 = vrot.lane.b32.xlu1 %v1471_v11, %s2206_s6  ;;  %s1795_s6 = scalar_lea.sflag [#allocation5], %s2393_s22 }
 0x369   : > { %1473 = vrot.lane.b32.xlu0 %v3087_v23, %s2207_s29 }
 0x36b   : > { %1475 = vrot.lane.b32.xlu1 %v1471_v11, %s2207_s29  ;;  %s2112_s29 = scalar_lea.vmem %s3225_s23, 128 }
 0x36c   : > { %p2113_p4 = scmp.ne.s32.totalorder %s3225_s23, %s2112_s29 }
 0x36d   : > { %1503 = vrot.lane.b32.xlu0 %v3087_v23, %s2208_s7 }
 0x36e   : > { %p2114_p6 = pnand %p2113_p4, %p2339_p13 }
 0x36f   : > { %1505 = vrot.lane.b32.xlu1 %v1471_v11, %s2208_s7  ;;  %s2118_s7 = scalar_lea.vmem %s2117_s21, 256 }
 0x370   : > { %p2115_p8 = pneg %p2114_p6  ;;  %p2120_p12 = scmp.lt.s32.totalorder %s2118_s7, %s2112_s29 }
 0x371   : > { %1565 = vrot.lane.b32.xlu0 %v3087_v23, %s2209_s11 }
 0x372   : > { %p2121_p0 = por %p2120_p12, %p2119_p9 }
 0x373   : > { %1567 = vrot.lane.b32.xlu1 %v1471_v11, %s2209_s11 }
 0x374   : > { %p2122_p5 = pnand %p2121_p0, %p2115_p8 }
 0x375   : > { %1711 = vperm.xlu0 %2052, %v1708_v62  }
 0x3d7   : > { %v1534_v2 = vpop.permute.xlu0 %1533 }
 0x3d9   : > { %v1536_v15 = vpop.permute.xlu1 %1535 }
 0x3da   : > { %v1537_v16 = vsel %vm617_vm12, %v1534_v2, %v1536_v15  ;;  %v1538_v17 = vsel %vm617_vm12, %v1536_v15, %v1534_v2 }
 0x3db   : > { %v1541_v25 = vrot.slane %v1537_v16, 2  ;;  %v1542_v32 = vrot.slane %v1538_v17, 2  ;;  %v1543_v19 = vrot.slane %v1537_v16, 3  ;;  %v1544_v34 = vrot.slane %v1538_v17, 3  ;;  %v1474_v49 = vpop.permute.xlu0 %1473 }
 0x3dc   : > { %v1545_v35 = vrot.slane %v1537_v16, 4  ;;  %v1546_v36 = vrot.slane %v1538_v17, 4  ;;  %v1547_v37 = vrot.slane %v1537_v16, 5  ;;  %v1548_v38 = vrot.slane %v1538_v17, 5 }
 0x3dd   : > { %v1557_v39 = vsel %vm300_vm3, %v1541_v25, -inf  ;;  %v1558_v41 = vsel %vm301_vm4, %v1542_v32, -inf  ;;  %v1559_v42 = vsel %vm300_vm3, %v1543_v19, -inf  ;;  %v3118_v26 = vsel %vm301_vm4, %v1544_v34, -inf  ;;  %v1476_v27 = vpop.permute.xlu1 %1475 }
 0x3de   : > { %v1561_v28 = vsel %vm300_vm3, %v1545_v35, -inf  ;;  %v1562_v29 = vsel %vm301_vm4, %v1546_v36, -inf  ;;  %v3126_v30 = vsel %vm300_vm3, %v1547_v37, -inf  ;;  %v3130_v31 = vsel %vm301_vm4, %v1548_v38, -inf }
 0x3df   : > { %v1628_v50 = vrot.slane %v1557_v39, 3  ;;  %v1629_v51 = vrot.slane %v1558_v41, 3  ;;  %v1630_v52 = vrot.slane %v1559_v42, 3  ;;  %v1631_v53 = vrot.slane %v3118_v26, 3  ;;  %v1504_v60 = vpop.permute.xlu0 %1503 }
 0x3e0   : > { %v1632_v54 = vrot.slane %v1561_v28, 3  ;;  %v1633_v55 = vrot.slane %v1562_v29, 3  ;;  %v1477_v33 = vsel %vm555_vm13, %v1474_v49, %v1476_v27  ;;  %v1478_v40 = vsel %vm555_vm13, %v1476_v27, %v1474_v49 }
 0x3e1   : > { %v1481_v43 = vrot.slane %v1477_v33, 6  ;;  %v1482_v44 = vrot.slane %v1478_v40, 6  ;;  %v1483_v45 = vrot.slane %v1477_v33, 7  ;;  %v1484_v46 = vrot.slane %v1478_v40, 7  ;;  %v1506_v5 = vpop.permute.xlu1 %1505 }
 0x3e2   : > { %v1485_v47 = vrot.slane %v1477_v33, 1  ;;  %v1486_v48 = vrot.slane %v1478_v40, 1  ;;  %v1499_v59 = vsel %vm300_vm3, %v1477_v33, -inf  ;;  %v1500_v4 = vsel %vm301_vm4, %v1478_v40, -inf }
 0x3e3   : > { %v1495_v8 = vsel %vm300_vm3, %v1481_v43, -inf  ;;  %v1496_v9 = vsel %vm301_vm4, %v1482_v44, -inf  ;;  %v1497_v10 = vsel %vm300_vm3, %v1483_v45, -inf  ;;  %v1498_v56 = vsel %vm301_vm4, %v1484_v46, -inf  ;;  %v1566_v44 = vpop.permute.xlu0 %1565 }
 0x3e4   : > { %v1501_v12 = vsel %vm300_vm3, %v1485_v47, -inf  ;;  %v1502_v13 = vsel %vm301_vm4, %v1486_v48, -inf  ;;  %v1605_v14 = vcombine.low %v1495_v8, %v1496_v9  ;;  %v1606_v57 = vcombine.low %v1497_v10, %v1498_v56 }
 0x3e5   : > { %v1634_v61 = vrot.slane %v3126_v30, 3  ;;  %v1607_v63 = vcombine.low %v1499_v59, %v1500_v4  ;;  %v1507_v58 = vsel %vm586_vm14, %v1504_v60, %v1506_v5  ;;  %v1508_v18 = vsel %vm586_vm14, %v1506_v5, %v1504_v60  ;;  %v1568_v27 = vpop.permute.xlu1 %1567 }
 0x3e6   : > { %v1609_v0 = vrot.slane %v1605_v14, 2  ;;  %v1610_v20 = vrot.slane %v1606_v57, 1  ;;  %v1511_v21 = vrot.slane %v1508_v18, 5  ;;  %v1512_v22 = vrot.slane %v1507_v58, 5 }
 0x3e7   : > { %v1608_v11 = vcombine.low %v1501_v12, %v1502_v13  ;;  %v1513_v24 = vrot.slane %v1508_v18, 6  ;;  %v1514_v62 = vrot.slane %v1507_v58, 6  ;;  %v1515_v1 = vrot.slane %v1508_v18, 7 }
 0x3e8   : > { %v1611_v2 = vsel %vm454_vm2, %v1610_v20, %v1609_v0  ;;  %v1516_v15 = vrot.slane %v1507_v58, 7  ;;  %v1525_v16 = vsel %vm300_vm3, %v1511_v21, -inf  ;;  %v1526_v17 = vsel %vm301_vm4, %v1512_v22, -inf }
 0x3e9   : > { %v1612_v25 = vsel %vm456_vm5, %v1610_v20, %v1611_v2  ;;  %v1527_v32 = vsel %vm300_vm3, %v1513_v24, -inf  ;;  %v1528_v19 = vsel %vm301_vm4, %v1514_v62, -inf  ;;  %v1529_v34 = vsel %vm300_vm3, %v1515_v1, -inf }
 0x3ea   : > { %v1613_v35 = vsel %vm459_vm6, %v1607_v63, %v1612_v25  ;;  %v1530_v36 = vsel %vm301_vm4, %v1516_v15, -inf  ;;  %v1531_v37 = vsel %vm300_vm3, %v1508_v18, -inf  ;;  %v1532_v38 = vsel %vm301_vm4, %v1507_v58, -inf }
 0x3eb   : > { %v1635_v39 = vrot.slane %v3130_v31, 3  ;;  %v1644_v41 = vmax.f32 %v1525_v16, %v1628_v50  ;;  %v1645_v42 = vmax.f32 %v1526_v17, %v1629_v51  ;;  %v1646_v26 = vmax.f32 %v1527_v32, %v1630_v52 }
 0x3ec   : > { %v1647_v28 = vmax.f32 %v1528_v19, %v1631_v53  ;;  %v1648_v29 = vmax.f32 %v1529_v34, %v1632_v54  ;;  %v1649_v30 = vmax.f32 %v1530_v36, %v1633_v55  ;;  %v1614_v49 = vsel %vm461_vm7, %v1607_v63, %v1613_v35 }
 0x3ed   : > { %v1650_v33 = vmax.f32 %v1531_v37, %v1634_v61  ;;  %v1651_v40 = vmax.f32 %v1532_v38, %v1635_v39  ;;  %v1660_v43 = vcombine.low %v1644_v41, %v1645_v42  ;;  %v1615_v45 = vrot.slane %v1608_v11, 7  ;;  %v1704_v42 = vld [vmem:[#allocation2] sm:$0xff] }
 0x3ee   : > { %v1661_v46 = vcombine.low %v1646_v26, %v1647_v28  ;;  %v1662_v47 = vcombine.low %v1648_v29, %v1649_v30  ;;  %v1569_v48 = vsel %vm650_vm15, %v1566_v44, %v1568_v27  ;;  %v1570_v50 = vsel %vm650_vm15, %v1568_v27, %v1566_v44  ;;  %v1703_v28 = vld [vmem:[%s3274_s2] sm:$0xf] }
 0x3ef   : > { %v1664_v31 = vrot.slane %v1660_v43, 3  ;;  %v1574_v51 = vrot.slane %v1569_v48, 1  ;;  %v1616_v52 = vsel %vm464_vm8, %v1615_v45, %v1614_v49  ;;  %v1573_v54 = vrot.slane %v1570_v50, 1 }
 0x3f0   : > { %v1665_v53 = vrot.slane %v1661_v46, 2  ;;  %v1575_v55 = vrot.slane %v1570_v50, 2  ;;  %v1663_v59 = vcombine.low %v1650_v33, %v1651_v40  ;;  %v1576_v4 = vrot.slane %v1569_v48, 2 }
 0x3f1   : > { %v1577_v5 = vrot.slane %v1570_v50, 3  ;;  %v1578_v8 = vrot.slane %v1569_v48, 3  ;;  %v1668_v10 = vrot.slane %v1662_v47, 1  ;;  %v1589_v56 = vsel %vm300_vm3, %v1573_v54, -inf }
 0x3f2   : > { %v1666_v9 = vsel %vm454_vm2, %v1665_v53, %v1664_v31  ;;  %v1590_v3 = vsel %vm301_vm4, %v1574_v51, -inf  ;;  %v1591_v13 = vsel %vm300_vm3, %v1575_v55, -inf  ;;  %v1592_v14 = vsel %vm301_vm4, %v1576_v4, -inf }
 0x3f3   : > { %v1667_v12 = vsel %vm456_vm5, %v1665_v53, %v1666_v9  ;;  %v1593_v57 = vsel %vm300_vm3, %v1577_v5, -inf  ;;  %v1579_v61 = vrot.slane %v1570_v50, 4  ;;  %v1580_v63 = vrot.slane %v1569_v48, 4 }
 0x3f4   : > { %v1669_v60 = vsel %vm459_vm6, %v1668_v10, %v1667_v12  ;;  %v1594_v58 = vsel %vm301_vm4, %v1578_v8, -inf  ;;  %v1683_v0 = vcombine.high %v1589_v56, %v1590_v3  ;;  %v1684_v20 = vcombine.high %v1591_v13, %v1592_v14  ;;  %v1712_v29 = vpop.permute.xlu0 %1711 }
 0x3f5   : > { %v1670_v18 = vsel %vm461_vm7, %v1668_v10, %v1669_v60  ;;  %v1685_v21 = vcombine.high %v1593_v57, %v1594_v58  ;;  %v1617_v22 = vsel %vm466_vm11, %v1615_v45, %v1616_v52  ;;  %v1595_v2 = vsel %vm300_vm3, %v1579_v61, -inf }
 0x3f6   : > { %v1671_v11 = vsel %vm464_vm8, %v1663_v59, %v1670_v18  ;;  %v1687_v24 = vrot.slane %v1683_v0, 3  ;;  %v1688_v62 = vrot.slane %v1684_v20, 2  ;;  %v1596_v15 = vsel %vm301_vm4, %v1580_v63, -inf }
 0x3f7   : > { %v1672_v1 = vsel %vm466_vm11, %v1663_v59, %v1671_v11  ;;  %v1619_v16 = vmax.f32 %v3087_v23, %v1617_v22  ;;  %v1691_v25 = vrot.slane %v1685_v21, 1  ;;  %v1686_v34 = vcombine.high %v1595_v2, %v1596_v15  ;;  %v1705_v23 = vld [vmem:[#allocation2 + $0x8] sm:$0xff] }
 0x3f8   : > { %v1689_v17 = vsel %vm454_vm2, %v1688_v62, %v1687_v24 }
 0x3f9   : > { %v1690_v32 = vsel %vm456_vm5, %v1688_v62, %v1689_v17  ;;  %v1674_v19 = vmax.f32 %v1619_v16, %v1672_v1 }
 0x3fa   : > { %v1692_v35 = vsel %vm459_vm6, %v1691_v25, %v1690_v32 }
 0x3fb   : > { %v1693_v36 = vsel %vm461_vm7, %v1691_v25, %v1692_v35 }
 0x3fc   : > { %v1694_v37 = vsel %vm464_vm8, %v1686_v34, %v1693_v36 }
 0x3fd   : > { %v1695_v6 = vsel %vm466_vm11, %v1686_v34, %v1694_v37 }
 0x3fe   : > { %v1697_v38 = vmax.f32 %v1674_v19, %v1695_v6 }
 0x400   : > { %v1699_v7 = vcombine.low %v1697_v38, %v1697_v38  ;;  %1702 = vst [vmem:[#allocation2 + $0x18] sm:$0xf0] %v1697_v38 }
 0x402   : > { %1701 = vst [vmem:[#allocation2 + $0x10] sm:$0xf0] %v1699_v7 }
 0x407   : > { %v1707_v39 = vld [vmem:[#allocation2 + $0x18] sm:$0xff] }
 0x408   : > { %v1965_v41 = vpack.c.bf16 %v1707_v39, %v1705_v23 }
 0x409   : > { %v1706_v26 = vld [vmem:[#allocation2 + $0x10] sm:$0xff] }
 0x40a   : > { %1966 = vmatprep.subr.bf16.mxu0 %v1965_v41  ;;  %v1967_v27 = vpack.c.bf16 %v1706_v26, %v1704_v42 }
 0x40c   : > { %1968 = vmatpush1.bf16.msra.mxu0 %v1967_v27 }
 0x40f   : > { %1957 = vmatmul.mubr.msk.f32.vlgmr.msra.gmra.mrb[0].mxu0 %vm1714_vm0, %v1703_v28 }
 0x4e2   : > { %v1784_v30 = vpop.f32.mrb[0].mxu0 }
 0x4e3   : > { %v1785_v49 = vadd.f32 %v1784_v30, %v1712_v29  ;;  %v1786_v33 = vpop.f32.mrb[1].mxu0 }
 0x4e4   : > { %v1787_v40 = vadd.f32 %v1786_v33, %v1712_v29 }
 0x4e6   : > { %v1791_v43 = vcombine.low %v1785_v49, %v1787_v40 }
 0x4e8   : > { %1793 = vst [vmem:[%s285_s13] sm:$0xff] %v1791_v43 }
 0x4e9   : > { %2125 = shalt.err (!%p2122_p5)
}
 0x4ea   : > { %s2126_s22 = scalar_lea.hbm %s3223_s14, 128  ;;  %s2130_s12 = scalar_lea.hbm %s3276_s4, 256 }
 0x4eb   : > { %p2127_p10 = scmp.ne.s32.totalorder %s3223_s14, %s2126_s22  ;;  %p2131_p7 = scmp.lt.u32.totalorder %s3223_s14, %s3276_s4 }
 0x4ec   : > { %p2132_p3 = scmp.lt.u32.totalorder %s2130_s12, %s2126_s22  ;;  %p2134_p4 = scmp.lt.u32.totalorder %s2126_s22, %s3223_s14 }
 0x4ed   : > { %p2128_p1 = pnand %p2127_p10, %p2339_p13 }
 0x4ee   : > { %p2133_p11 = por %p2132_p3, %p2131_p7 }
 0x4ef   : > { %p2129_p2 = pneg %p2128_p1 }
 0x4f0   : > { %p2135_p6 = por %p2134_p4, %p2133_p11 }
 0x4f2   : > { %p2136_p8 = pnand %p2135_p6, %p2129_p2 }
 0x4f4   : > { %2139 = shalt.err (!%p2136_p8)
}
 0x4f5   : > { %1975 = dma.vmem_to_hbm [thread:$0]  (%p2339_p13), %s3225_s23, 128, %s3223_s14, %s1795_s6  }
 0x4f6 PF: > { %s1823_s30 = sand.u32 1, %s2178_s15   ;;  %p3295_p9 = scmp.ne.s32.totalorder %s3284_s26, 0 }
 0x4f7   : > { %p3296_p12 = scmp.ge.s32.totalorder %s2198_s20, 2  ;;  %s1824_s13 = scalar_lea.sflag [#allocation5], %s1823_s30 }
 0x4f9   : > { %p1986_p0 = pnand %p3296_p12, %p3295_p9 }
 0x4fb   : > { %2173 = dma.done.wait (!%p1986_p0), %s1824_s13, 128  }
 0x4fc   : > { %2175 = vsyncadd (!%p1986_p0), %s1824_s13, 4294967168  ;;  %s21_s20 = sadd.s32 1, %s2198_s20   ;;  %s3297_s15 = smov %s2182_s16 }
 0x4fd   : > { %p18_p5 = scmp.ge.s32.totalorder %s21_s20, 4   ;;  %s3298_s16 = smov %s2186_s17 }
 0x4fe   : > { %s3299_s17 = smov %s2347_s10  ;;  %s3300_s18 = smov %s2194_s19 }
 0x4ff   : > { %s3301_s19 = smov %s3303_s5  ;;  %20 = sbr.rel (!%p18_p5) target bundleno = 7 (0x7), region = 92 }
 0x506   :  { %1829 = vsyncpa [#allocation4], 1 }
 0x507   :  { %1831 = vsyncpa [#allocation4 + $0x1], 1 }
 0x508   :  { %1832 = vsyncpa [#allocation7], 1 }
 0x509   :  { %1834 = vsyncpa [#allocation7 + $0x1], 1 }
 0x50a   :  { %1835 = vsyncpa [#allocation5], 1 }
 0x50b   :  { %1837 = vsyncpa [#allocation5 + $0x1], 1 }

</bundles_post_ra>
